<compile_context>
chip_gen: v6e
topology: v6e:2x2x1
jax: 0.10.0
libtpu: 0.0.40
codegen_flags: <defaults>
</compile_context>

<pallas_src>
import jax
import jax.numpy as jnp
from jax.experimental import pallas as pl
from jax.experimental.pallas import tpu as pltpu

_BN_EPS = 1e-5


def _contextnet1d_kernel(x_ref, mask_ref, w1_ref, s1_ref, t1_ref,
                         w2_ref, s2_ref, t2_ref, w3_ref, b3_ref, out_ref):
    hid = w1_ref.shape[0]                    # 64 hidden channels (sublanes)
    K = w3_ref.shape[0] // hid               # 5 taps
    pad = (K - 1) // 2                       # 2
    n = x_ref.shape[1]                       # tb * Lr flattened (row, seq) lanes

    mask = mask_ref[...]                     # (1, n): 1 inside each row's valid L
    mdtype = w2_ref.dtype                    # matmul operand dtype (bf16 or f32)

    # ---- conv1: one MXU matmul on the wrapper-built im2col slab + BN1 + ReLU.
    a1 = jnp.dot(w1_ref[...], x_ref[...], preferred_element_type=jnp.float32)
    h1 = (jnp.maximum(a1 * s1_ref[...] + t1_ref[...], 0.0) * mask).astype(mdtype)

    # ---- conv2: tap shifts via XLU lane rolls (row halos are zero thanks to
    # the mask), sublane-concat into a (K*64, n) slab, one MXU matmul, BN2+ReLU.
    taps = [h1 if t == pad else pltpu.roll(h1, shift=(pad - t) % n, axis=1)
            for t in range(K)]
    h1cat = jnp.concatenate(taps, axis=0)                          # (K*64, n)
    a2 = jnp.dot(w2_ref[...], h1cat, preferred_element_type=jnp.float32)
    h2 = jnp.maximum(a2 * s2_ref[...] + t2_ref[...], 0.0) * mask   # (64, n) f32

    # ---- conv3 (C_out = 1): per-tap VPU multiply-accumulate + sublane reduce.
    acc = h2 * w3_ref[pad * hid:(pad + 1) * hid, :]
    for t in range(K):
        if t == pad:
            continue
        ht = pltpu.roll(h2, shift=(pad - t) % n, axis=1)
        acc = acc + ht * w3_ref[t * hid:(t + 1) * hid, :]
    z = jnp.sum(acc, axis=0, keepdims=True) + b3_ref[0, 0]         # (1, n)

    out_ref[...] = z.astype(out_ref.dtype)                         # lane-dense


def contextnet1d(x, params, *, tb=None, matmul_dtype=jnp.bfloat16,
                 vmem_limit_bytes=32 * 1024 * 1024):
    """x: (B, C_in, L) float32 (PyTorch layout). Returns (B, 1, L) float32."""
    B, c_in, L = x.shape
    w1, w2, w3 = params["w1"], params["w2"], params["w3"]   # PyTorch OIW
    hid, _, K = w1.shape
    pad = (K - 1) // 2

    # Fold conv bias + eval-mode BatchNorm into per-channel scale/shift.
    s1 = params["g1"] * jax.lax.rsqrt(params["v1"] + _BN_EPS)
    t1 = (params["b1"] - params["m1"]) * s1 + params["beta1"]
    s2 = params["g2"] * jax.lax.rsqrt(params["v2"] + _BN_EPS)
    t2 = (params["b2"] - params["m2"]) * s2 + params["beta2"]

    # Batch tile: keep >= 2 grid steps when possible (v7x has 2 TensorCores).
    if tb is None:
        tb = max(1, min(8, B // 2))
    Bp = pl.cdiv(B, tb) * tb
    grid = Bp // tb

    # Per-row lane length: [2 zeros | x (L) | zeros], rounded up to 128 lanes.
    Lr = pl.cdiv(L + 2 * pad, 128) * 128
    n_tile = tb * Lr

    # conv1 im2col slab, built once in the wrapper:
    #   xcat[t*C_in + c, b*Lr + p] = x_padded_row[b, c, p + t]
    xrow = jnp.pad(x.astype(jnp.float32),
                   ((0, Bp - B), (0, 0), (pad, Lr + pad - L)))  # (Bp, C, Lr+2p)
    xcat = jnp.stack([xrow[:, :, t:t + Lr] for t in range(K)], axis=1)
    xcat = xcat.transpose(1, 2, 0, 3).reshape(K * c_in, Bp * Lr)
    xcat = xcat.astype(matmul_dtype)

    # Valid-position mask: zeros each row's padding so lane rolls never leak
    # across row boundaries and the BN shift does not pollute the halo.
    mrow = (jnp.arange(Lr) < L).astype(jnp.float32)
    mask = jnp.tile(mrow, (Bp,)).reshape(1, Bp * Lr)

    # Kernel-friendly weight layouts.
    w1cat = jnp.transpose(w1, (0, 2, 1)).reshape(hid, K * c_in).astype(matmul_dtype)
    w2cat = jnp.transpose(w2, (0, 2, 1)).reshape(hid, K * hid).astype(matmul_dtype)
    w3col = jnp.transpose(w3[0], (1, 0)).reshape(K * hid, 1).astype(jnp.float32)
    b3 = params["b3"].reshape(1, 1).astype(jnp.float32)
    s1c, t1c = s1.reshape(hid, 1), t1.reshape(hid, 1)
    s2c, t2c = s2.reshape(hid, 1), t2.reshape(hid, 1)

    flops = 2 * Bp * Lr * (K * c_in * hid + K * hid * hid + K * hid)
    bytes_accessed = (xcat.size * xcat.dtype.itemsize + mask.size * 4
                      + w1cat.size * w1cat.dtype.itemsize
                      + w2cat.size * w2cat.dtype.itemsize
                      + w3col.size * 4 + Bp * Lr * 4 + 4 * (4 * hid + 1))
    cost = pl.CostEstimate(flops=int(flops), transcendentals=0,
                           bytes_accessed=int(bytes_accessed))

    out = pl.pallas_call(
        _contextnet1d_kernel,
        out_shape=jax.ShapeDtypeStruct((1, Bp * Lr), jnp.float32),
        grid_spec=pltpu.PrefetchScalarGridSpec(
            num_scalar_prefetch=0,
            grid=(grid,),
            in_specs=[
                pl.BlockSpec((K * c_in, n_tile), lambda i: (0, i)),   # x im2col
                pl.BlockSpec((1, n_tile), lambda i: (0, i)),          # mask
                pl.BlockSpec((hid, K * c_in), lambda i: (0, 0)),      # conv1 W
                pl.BlockSpec((hid, 1), lambda i: (0, 0)),             # BN1 scale
                pl.BlockSpec((hid, 1), lambda i: (0, 0)),             # BN1 shift
                pl.BlockSpec((hid, K * hid), lambda i: (0, 0)),       # conv2 W
                pl.BlockSpec((hid, 1), lambda i: (0, 0)),             # BN2 scale
                pl.BlockSpec((hid, 1), lambda i: (0, 0)),             # BN2 shift
                pl.BlockSpec((K * hid, 1), lambda i: (0, 0)),         # conv3 W
                pl.BlockSpec(memory_space=pltpu.MemorySpace.SMEM),    # conv3 bias
            ],
            out_specs=pl.BlockSpec((1, n_tile), lambda i: (0, i)),
        ),
        compiler_params=pltpu.CompilerParams(
            dimension_semantics=("parallel",),     # batch tiles are independent
            vmem_limit_bytes=vmem_limit_bytes,
        ),
        cost_estimate=cost,
    )(xcat, mask, w1cat, s1c, t1c, w2cat, s2c, t2c, w3col, b3)

    return out.reshape(Bp, Lr)[:B, :L][:, None, :]


def _reference(x, p, eps=_BN_EPS):
    """Pure-JAX reference matching the PyTorch eval-mode forward."""
    prec = jax.lax.Precision.HIGHEST

    def conv(v, w, b):
        y = jax.lax.conv_general_dilated(
            v, w, window_strides=(1,), padding=((2, 2),),
            dimension_numbers=("NCH", "OIH", "NCH"), precision=prec)
        return y + b[None, :, None]

    def bn(v, g, beta, m, var):
        return ((v - m[None, :, None]) / jnp.sqrt(var + eps)[None, :, None]
                * g[None, :, None] + beta[None, :, None])

    h = jax.nn.relu(bn(conv(x, p["w1"], p["b1"]),
                       p["g1"], p["beta1"], p["m1"], p["v1"]))
    h = jax.nn.relu(bn(conv(h, p["w2"], p["b2"]),
                       p["g2"], p["beta2"], p["m2"], p["v2"]))
    return conv(h, p["w3"], p["b3"])


if __name__ == "__main__":
    key = jax.random.PRNGKey(0)
    ks = jax.random.split(key, 16)

    B, C_in, L = 4, 4, 16
    HH, K = 64, 5

    def u(k, shape, bound):
        return jax.random.uniform(k, shape, jnp.float32, -bound, bound)

    bnd1 = 1.0 / float(jnp.sqrt(jnp.float32(C_in * K)))
    bnd2 = 1.0 / float(jnp.sqrt(jnp.float32(HH * K)))

    params = {
        "w1": u(ks[0], (HH, C_in, K), bnd1), "b1": u(ks[1], (HH,), bnd1),
        "g1": 1.0 + 0.1 * jax.random.normal(ks[2], (HH,), jnp.float32),
        "beta1": 0.1 * jax.random.normal(ks[3], (HH,), jnp.float32),
        "m1": 0.1 * jax.random.normal(ks[4], (HH,), jnp.float32),
        "v1": jax.random.uniform(ks[5], (HH,), jnp.float32, 0.5, 1.5),
        "w2": u(ks[6], (HH, HH, K), bnd2), "b2": u(ks[7], (HH,), bnd2),
        "g2": 1.0 + 0.1 * jax.random.normal(ks[8], (HH,), jnp.float32),
        "beta2": 0.1 * jax.random.normal(ks[9], (HH,), jnp.float32),
        "m2": 0.1 * jax.random.normal(ks[10], (HH,), jnp.float32),
        "v2": jax.random.uniform(ks[11], (HH,), jnp.float32, 0.5, 1.5),
        "w3": u(ks[12], (1, HH, K), bnd2), "b3": u(ks[13], (1,), bnd2),
    }
    x = jax.random.normal(ks[14], (B, C_in, L), jnp.float32)

    ref = _reference(x, params)

    # f32 matmul-operand path (tight tolerance).
    out_f32 = jax.block_until_ready(
        contextnet1d(x, params, matmul_dtype=jnp.float32))
    assert out_f32.shape == ref.shape == (B, 1, L), (out_f32.shape, ref.shape)
    err_f32 = float(jnp.max(jnp.abs(out_f32 - ref)))
    assert jnp.allclose(out_f32, ref, rtol=2e-3, atol=2e-3), err_f32

    # bf16 matmul-operand path (default; f32 accumulation -> looser tolerance).
    out_bf16 = jax.block_until_ready(contextnet1d(x, params))
    assert out_bf16.shape == (B, 1, L), out_bf16.shape
    err_bf16 = float(jnp.max(jnp.abs(out_bf16 - ref)))
    assert jnp.allclose(out_bf16, ref, rtol=1e-2, atol=1e-2), err_bf16

    print("KERNEL_OK")
</pallas_src>

<mosaic_0001>
module attributes {stable_mosaic.version = 11 : i64} {
  func.func @_contextnet1d_kernel(%arg0: i32, %arg1: memref<20x256xf32, #tpu.memory_space<vmem>>, %arg2: memref<1x256xf32, #tpu.memory_space<vmem>>, %arg3: memref<64x20xf32, #tpu.memory_space<vmem>>, %arg4: memref<64x1xf32, #tpu.memory_space<vmem>>, %arg5: memref<64x1xf32, #tpu.memory_space<vmem>>, %arg6: memref<64x320xf32, #tpu.memory_space<vmem>>, %arg7: memref<64x1xf32, #tpu.memory_space<vmem>>, %arg8: memref<64x1xf32, #tpu.memory_space<vmem>>, %arg9: memref<320x1xf32, #tpu.memory_space<vmem>>, %arg10: memref<1x1xf32, #tpu.memory_space<smem>>, %arg11: memref<1x256xf32, #tpu.memory_space<vmem>>) attributes {dimension_semantics = [#tpu.dimension_semantics<parallel>], iteration_bounds = array<i64: 2>, scalar_prefetch = 0 : i64, scratch_operands = 0 : i64, tpu.core_type = #tpu.core_type<tc>, window_params = [{transform_indices = @transform_0, window_bounds = array<i64: 20, 256>}, {transform_indices = @transform_1, window_bounds = array<i64: 1, 256>}, {pipeline_mode = #tpu.pipeline_mode<synchronous>, transform_indices = @transform_2, window_bounds = array<i64: 64, 20>}, {pipeline_mode = #tpu.pipeline_mode<synchronous>, transform_indices = @transform_3, window_bounds = array<i64: 64, 1>}, {pipeline_mode = #tpu.pipeline_mode<synchronous>, transform_indices = @transform_4, window_bounds = array<i64: 64, 1>}, {pipeline_mode = #tpu.pipeline_mode<synchronous>, transform_indices = @transform_5, window_bounds = array<i64: 64, 320>}, {pipeline_mode = #tpu.pipeline_mode<synchronous>, transform_indices = @transform_6, window_bounds = array<i64: 64, 1>}, {pipeline_mode = #tpu.pipeline_mode<synchronous>, transform_indices = @transform_7, window_bounds = array<i64: 64, 1>}, {pipeline_mode = #tpu.pipeline_mode<synchronous>, transform_indices = @transform_8, window_bounds = array<i64: 320, 1>}, {transform_indices = @transform_9, window_bounds = array<i64: 1, 1>}, {transform_indices = @transform_10, window_bounds = array<i64: 1, 256>}]} {
    %c0 = arith.constant 0 : index
    %c0_0 = arith.constant 0 : index
    %0 = vector.load %arg2[%c0, %c0_0] : memref<1x256xf32, #tpu.memory_space<vmem>>, vector<1x256xf32>
    %c0_1 = arith.constant 0 : index
    %c0_2 = arith.constant 0 : index
    %1 = vector.load %arg3[%c0_1, %c0_2] : memref<64x20xf32, #tpu.memory_space<vmem>>, vector<64x20xf32>
    %c0_3 = arith.constant 0 : index
    %c0_4 = arith.constant 0 : index
    %2 = vector.load %arg1[%c0_3, %c0_4] : memref<20x256xf32, #tpu.memory_space<vmem>>, vector<20x256xf32>
    %cst = arith.constant dense<0.000000e+00> : vector<64x256xf32>
    %3 = tpu.matmul %1, %2, %cst {dimension_numbers = #tpu.dot_dimension_numbers<[1], [0], [0], [1], [0, 0, 1, 1], [], []>} : vector<64x20xf32>, vector<20x256xf32>, vector<64x256xf32> -> vector<64x256xf32>
    %c0_5 = arith.constant 0 : index
    %c0_6 = arith.constant 0 : index
    %4 = vector.load %arg4[%c0_5, %c0_6] : memref<64x1xf32, #tpu.memory_space<vmem>>, vector<64x1xf32>
    %5 = vector.broadcast %4 : vector<64x1xf32> to vector<64x256xf32>
    %6 = arith.mulf %3, %5 : vector<64x256xf32>
    %c0_7 = arith.constant 0 : index
    %c0_8 = arith.constant 0 : index
    %7 = vector.load %arg5[%c0_7, %c0_8] : memref<64x1xf32, #tpu.memory_space<vmem>>, vector<64x1xf32>
    %8 = vector.broadcast %7 : vector<64x1xf32> to vector<64x256xf32>
    %9 = arith.addf %6, %8 : vector<64x256xf32>
    %cst_9 = arith.constant 0.000000e+00 : f32
    %10 = vector.broadcast %cst_9 : f32 to vector<64x256xf32>
    %11 = arith.maximumf %9, %10 : vector<64x256xf32>
    %12 = vector.broadcast %0 : vector<1x256xf32> to vector<64x256xf32>
    %13 = arith.mulf %11, %12 : vector<64x256xf32>
    %c2_i32 = arith.constant 2 : i32
    %14 = tpu.dynamic_rotate %13 by %c2_i32 dim 1 : vector<64x256xf32>, i32 -> vector<64x256xf32>
    %c1_i32 = arith.constant 1 : i32
    %15 = tpu.dynamic_rotate %13 by %c1_i32 dim 1 : vector<64x256xf32>, i32 -> vector<64x256xf32>
    %c255_i32 = arith.constant 255 : i32
    %16 = tpu.dynamic_rotate %13 by %c255_i32 dim 1 : vector<64x256xf32>, i32 -> vector<64x256xf32>
    %c254_i32 = arith.constant 254 : i32
    %17 = tpu.dynamic_rotate %13 by %c254_i32 dim 1 : vector<64x256xf32>, i32 -> vector<64x256xf32>
    %18 = tpu.concatenate %14, %15, %13, %16, %17 in 0 : vector<64x256xf32>, vector<64x256xf32>, vector<64x256xf32>, vector<64x256xf32>, vector<64x256xf32> -> vector<320x256xf32>
    %c0_10 = arith.constant 0 : index
    %c0_11 = arith.constant 0 : index
    %19 = vector.load %arg6[%c0_10, %c0_11] : memref<64x320xf32, #tpu.memory_space<vmem>>, vector<64x320xf32>
    %cst_12 = arith.constant dense<0.000000e+00> : vector<64x256xf32>
    %20 = tpu.matmul %19, %18, %cst_12 {dimension_numbers = #tpu.dot_dimension_numbers<[1], [0], [0], [1], [0, 0, 1, 1], [], []>} : vector<64x320xf32>, vector<320x256xf32>, vector<64x256xf32> -> vector<64x256xf32>
    %c0_13 = arith.constant 0 : index
    %c0_14 = arith.constant 0 : index
    %21 = vector.load %arg7[%c0_13, %c0_14] : memref<64x1xf32, #tpu.memory_space<vmem>>, vector<64x1xf32>
    %22 = vector.broadcast %21 : vector<64x1xf32> to vector<64x256xf32>
    %23 = arith.mulf %20, %22 : vector<64x256xf32>
    %c0_15 = arith.constant 0 : index
    %c0_16 = arith.constant 0 : index
    %24 = vector.load %arg8[%c0_15, %c0_16] : memref<64x1xf32, #tpu.memory_space<vmem>>, vector<64x1xf32>
    %25 = vector.broadcast %24 : vector<64x1xf32> to vector<64x256xf32>
    %26 = arith.addf %23, %25 : vector<64x256xf32>
    %cst_17 = arith.constant 0.000000e+00 : f32
    %27 = vector.broadcast %cst_17 : f32 to vector<64x256xf32>
    %28 = arith.maximumf %26, %27 : vector<64x256xf32>
    %29 = vector.broadcast %0 : vector<1x256xf32> to vector<64x256xf32>
    %30 = arith.mulf %28, %29 : vector<64x256xf32>
    %c128 = arith.constant 128 : index
    %c0_18 = arith.constant 0 : index
    %31 = vector.load %arg9[%c128, %c0_18] : memref<320x1xf32, #tpu.memory_space<vmem>>, vector<64x1xf32>
    %32 = vector.broadcast %31 : vector<64x1xf32> to vector<64x256xf32>
    %33 = arith.mulf %30, %32 : vector<64x256xf32>
    %c2_i32_19 = arith.constant 2 : i32
    %34 = tpu.dynamic_rotate %30 by %c2_i32_19 dim 1 : vector<64x256xf32>, i32 -> vector<64x256xf32>
    %c0_20 = arith.constant 0 : index
    %c0_21 = arith.constant 0 : index
    %35 = vector.load %arg9[%c0_20, %c0_21] : memref<320x1xf32, #tpu.memory_space<vmem>>, vector<64x1xf32>
    %36 = vector.broadcast %35 : vector<64x1xf32> to vector<64x256xf32>
    %37 = arith.mulf %34, %36 : vector<64x256xf32>
    %38 = arith.addf %33, %37 : vector<64x256xf32>
    %c1_i32_22 = arith.constant 1 : i32
    %39 = tpu.dynamic_rotate %30 by %c1_i32_22 dim 1 : vector<64x256xf32>, i32 -> vector<64x256xf32>
    %c64 = arith.constant 64 : index
    %c0_23 = arith.constant 0 : index
    %40 = vector.load %arg9[%c64, %c0_23] : memref<320x1xf32, #tpu.memory_space<vmem>>, vector<64x1xf32>
    %41 = vector.broadcast %40 : vector<64x1xf32> to vector<64x256xf32>
    %42 = arith.mulf %39, %41 : vector<64x256xf32>
    %43 = arith.addf %38, %42 : vector<64x256xf32>
    %c255_i32_24 = arith.constant 255 : i32
    %44 = tpu.dynamic_rotate %30 by %c255_i32_24 dim 1 : vector<64x256xf32>, i32 -> vector<64x256xf32>
    %c192 = arith.constant 192 : index
    %c0_25 = arith.constant 0 : index
    %45 = vector.load %arg9[%c192, %c0_25] : memref<320x1xf32, #tpu.memory_space<vmem>>, vector<64x1xf32>
    %46 = vector.broadcast %45 : vector<64x1xf32> to vector<64x256xf32>
    %47 = arith.mulf %44, %46 : vector<64x256xf32>
    %48 = arith.addf %43, %47 : vector<64x256xf32>
    %c254_i32_26 = arith.constant 254 : i32
    %49 = tpu.dynamic_rotate %30 by %c254_i32_26 dim 1 : vector<64x256xf32>, i32 -> vector<64x256xf32>
    %c256 = arith.constant 256 : index
    %c0_27 = arith.constant 0 : index
    %50 = vector.load %arg9[%c256, %c0_27] : memref<320x1xf32, #tpu.memory_space<vmem>>, vector<64x1xf32>
    %51 = vector.broadcast %50 : vector<64x1xf32> to vector<64x256xf32>
    %52 = arith.mulf %49, %51 : vector<64x256xf32>
    %53 = arith.addf %48, %52 : vector<64x256xf32>
    %cst_28 = arith.constant dense<0.000000e+00> : vector<256xf32>
    %54 = vector.multi_reduction <add>, %53, %cst_28 [0] : vector<64x256xf32> to vector<256xf32>
    %55 = vector.shape_cast %54 : vector<256xf32> to vector<1x256xf32>
    %c0_29 = arith.constant 0 : index
    %c0_30 = arith.constant 0 : index
    %56 = memref.load %arg10[%c0_29, %c0_30] : memref<1x1xf32, #tpu.memory_space<smem>>
    %57 = vector.broadcast %56 : f32 to vector<1x256xf32>
    %58 = arith.addf %55, %57 : vector<1x256xf32>
    %c0_31 = arith.constant 0 : index
    %c0_32 = arith.constant 0 : index
    %59 = vector.load %arg11[%c0_31, %c0_32] : memref<1x256xf32, #tpu.memory_space<vmem>>, vector<1x256xf32>
    tpu.vector_store %arg11[%c0_31, %c0_32], %58 {strides = array<i32>} : memref<1x256xf32, #tpu.memory_space<vmem>>, vector<1x256xf32>,
    return
  }
  func.func @transform_0(%arg0: i32) -> (i32, i32) {
    %c0_i32 = arith.constant 0 : i32
    %c0_i32_0 = arith.constant 0 : i32
    return %c0_i32, %arg0 : i32, i32
  }
  func.func @transform_1(%arg0: i32) -> (i32, i32) {
    %c0_i32 = arith.constant 0 : i32
    %c0_i32_0 = arith.constant 0 : i32
    return %c0_i32, %arg0 : i32, i32
  }
  func.func @transform_2(%arg0: i32) -> (i32, i32) {
    %c0_i32 = arith.constant 0 : i32
    %c0_i32_0 = arith.constant 0 : i32
    %c0_i32_1 = arith.constant 0 : i32
    return %c0_i32, %c0_i32_0 : i32, i32
  }
  func.func @transform_3(%arg0: i32) -> (i32, i32) {
    %c0_i32 = arith.constant 0 : i32
    %c0_i32_0 = arith.constant 0 : i32
    %c0_i32_1 = arith.constant 0 : i32
    return %c0_i32, %c0_i32_0 : i32, i32
  }
  func.func @transform_4(%arg0: i32) -> (i32, i32) {
    %c0_i32 = arith.constant 0 : i32
    %c0_i32_0 = arith.constant 0 : i32
    %c0_i32_1 = arith.constant 0 : i32
    return %c0_i32, %c0_i32_0 : i32, i32
  }
  func.func @transform_5(%arg0: i32) -> (i32, i32) {
    %c0_i32 = arith.constant 0 : i32
    %c0_i32_0 = arith.constant 0 : i32
    %c0_i32_1 = arith.constant 0 : i32
    return %c0_i32, %c0_i32_0 : i32, i32
  }
  func.func @transform_6(%arg0: i32) -> (i32, i32) {
    %c0_i32 = arith.constant 0 : i32
    %c0_i32_0 = arith.constant 0 : i32
    %c0_i32_1 = arith.constant 0 : i32
    return %c0_i32, %c0_i32_0 : i32, i32
  }
  func.func @transform_7(%arg0: i32) -> (i32, i32) {
    %c0_i32 = arith.constant 0 : i32
    %c0_i32_0 = arith.constant 0 : i32
    %c0_i32_1 = arith.constant 0 : i32
    return %c0_i32, %c0_i32_0 : i32, i32
  }
  func.func @transform_8(%arg0: i32) -> (i32, i32) {
    %c0_i32 = arith.constant 0 : i32
    %c0_i32_0 = arith.constant 0 : i32
    %c0_i32_1 = arith.constant 0 : i32
    return %c0_i32, %c0_i32_0 : i32, i32
  }
  func.func @transform_9(%arg0: i32) -> (i32, i32) {
    %c0_i32 = arith.constant 0 : i32
    %c0_i32_0 = arith.constant 0 : i32
    %c0_i32_1 = arith.constant 0 : i32
    return %c0_i32, %c0_i32_0 : i32, i32
  }
  func.func @transform_10(%arg0: i32) -> (i32, i32) {
    %c0_i32 = arith.constant 0 : i32
    %c0_i32_0 = arith.constant 0 : i32
    return %c0_i32, %arg0 : i32, i32
  }
}

</mosaic_0001>

<bundles_post_ra>
// kernel: tpu_custom_call.1
= control target key start
LH: loop header
LB: loop body
LE: loop exit
PB: predicated region body
PF: predicated region fallthrough
CT: control target
= control target key end

     0   :  { %s3832_s0 = inlined_call_operand.vmem [shape: f32[20,512], index: 0, kind: input, shape index: {}]   ;;  %s3833_s1 = inlined_call_operand.vmem [shape: f32[1,512], index: 1, kind: input, shape index: {}]   ;;  %s3834_s2 = inlined_call_operand.vmem [shape: f32[64,20], index: 2, kind: input, shape index: {}]   ;;  %s3835_s3 = inlined_call_operand.vmem [shape: f32[64,1], index: 3, kind: input, shape index: {}]   ;;  %s3836_s4 = inlined_call_operand.vmem [shape: f32[64,1], index: 4, kind: input, shape index: {}]   ;;  %s3837_s5 = inlined_call_operand.vmem [shape: f32[64,320], index: 5, kind: input, shape index: {}]   ;;  %s3838_s6 = inlined_call_operand.vmem [shape: f32[64,1], index: 6, kind: input, shape index: {}]   ;;  %s3839_s7 = inlined_call_operand.vmem [shape: f32[64,1], index: 7, kind: input, shape index: {}]   ;;  %s3840_s8 = inlined_call_operand.vmem [shape: f32[320,1], index: 8, kind: input, shape index: {}]   ;;  %s3841_s9 = inlined_call_operand.<no memory space> [shape: f32[1,1], index: 9, kind: input, shape index: {}]   ;;  %s3842_s10 = inlined_call_operand.hbm [shape: f32[1,512], index: 10, kind: output, shape index: {}]  }
   0x1   :  { %15 = sst [smem:[#allocation2]] %s3841_s9 }
   0x2   :  { %16 = vsyncpa [#allocation5], 0 }
   0x3   :  { %18 = vsyncpa [#allocation5 + $0x1], 0  ;;  %s2303_s15 = smov 0   ;;  %s2305_s16 = smov 0  }
   0x4   :  { %s2307_s17 = smov 0   ;;  %s2309_s18 = smov 0  }
   0x5 LB: > { %s2324_s9 = sadd.s32 4294967295, %s2235_s18   ;;  %s2092_s19 = sadd.s32 4294967294, %s2235_s18   ;;  %s2235_s18 = sphi %s2309_s18, %s3894_s18   ;;  %s2231_s17 = sphi %s2307_s17, %s3893_s17   ;;  %s2227_s16 = sphi %s2305_s16, %s3892_s16   ;;  %s2223_s15 = sphi %s2303_s15, %s3891_s15  }
   0x6   : > { %s2328_s20 = sadd.s32 1, %s2235_s18   ;;  %s31_s21 = sadd.s32 1, %s2231_s17 }
   0x7   : > { %s28_s22 = ssub.s32 %s2235_s18, %s2328_s20  ;;  %p38_p0 = scmp.ne.s32.totalorder %s2231_s17, %s2227_s16 }
   0x8   : > { %p29_p1 = scmp.eq.s32.totalorder %s28_s22, 0  ;;  %p39_p2 = scmp.eq.s32.totalorder %s2235_s18, 0 }
   0x9   : > { %p262_p3 = scmp.eq.s32.totalorder %s2324_s9, 1  ;;  %p267_p4 = scmp.ne.s32.totalorder %s2227_s16, %s2223_s15 }
   0xa   : > { %s2340_s23 = scalar_select %p29_p1, %s2231_s17, %s31_s21  }
   0xb   : > { %p40_p5 = por %p39_p2, %p38_p0  ;;  %p2342_p6 = por %p262_p3, %p38_p0 }
   0xc   : > { %p268_p7 = scmp.eq.s32.totalorder %s2092_s19, 1  ;;  %p3859_p9 = scmp.ge.s32.totalorder %s2235_s18, 2 }
   0xe   : > { %p2346_p8 = por %p268_p7, %p267_p4  ;;  %308 = sbr.rel (%p3859_p9) target bundleno = 26 (0x1a), region = 48 }
  0x13   : > { %311 = sbr.rel (!%p40_p5) target bundleno = 26 (0x1a), region = 52  ;;  %s313_s26 = sand.u32 (%p40_p5), 1, %s2231_s17  }
  0x14   : > { %s2123_s27 = sshll.u32 (%p40_p5), %s2235_s18, 4  ;;  %s2125_s28 = smul.u32 (%p40_p5), 48, %s313_s26 }
  0x15   : > { %s318_s11 = scalar_lea.vmem (%p40_p5), %s3832_s0, %s2123_s27 }
  0x16   : > { %v331_v0 = vld [vmem:[%s318_s11] sm:$0xff] (%p40_p5)  ;;  %v333_v1 = vld [vmem:[%s318_s11 + $0x8] sm:$0xff] (%p40_p5)  ;;  %s315_s12 = scalar_lea.vmem (%p40_p5), [#allocation3], %s2125_s28 }
  0x17   : > { %v335_v2 = vld [vmem:[%s318_s11 + $0x20] sm:$0xff] (%p40_p5)  ;;  %v337_v3 = vld [vmem:[%s318_s11 + $0x28] sm:$0xff] (%p40_p5)  ;;  %332 = vst [vmem:[%s315_s12] sm:$0xff] (%p40_p5), %v331_v0  ;;  %334 = vst [vmem:[%s315_s12 + $0x8] sm:$0xff] (%p40_p5), %v333_v1 }
  0x18   : > { %v339_v4 = vld [vmem:[%s318_s11 + $0x40] sm:$0xff]  ;;  %v341_v5 = vld [vmem:[%s318_s11 + $0x48] sm:$0xff]  ;;  %336 = vst [vmem:[%s315_s12 + $0x10] sm:$0xff] %v335_v2  ;;  %338 = vst [vmem:[%s315_s12 + $0x18] sm:$0xff] %v337_v3 }
  0x19   : > { %340 = vst [vmem:[%s315_s12 + $0x20] sm:$0xff] %v339_v4  ;;  %342 = vst [vmem:[%s315_s12 + $0x28] sm:$0xff] %v341_v5 }
  0x1a PF: > { %p2097_p10 = scmp.ge.s32.totalorder %s2235_s18, 1  ;;  %p355_p11 = scmp.lt.s32.totalorder %s2235_s18, 3 }
  0x1c   : > { %p356_p12 = pnand %p2097_p10, %p355_p11 }
  0x1e   : > { %359 = sbr.rel (%p356_p12) target bundleno = 983 (0x3d7), region = 79 }
  0x23   : > { %s2361_s13 = sand.u32 1, %s2227_s16   ;;  %v2237_v6 = vmov 0.0   ;;  %vm450_vm0 = vcmask 1043456   ;;  %v2238_v7 = vmov 0   ;;  %v572_v8 = vld [vmem:[%s3835_s3 + $0x10] sm:$0xff]  ;;  %v573_v9 = vld [vmem:[%s3835_s3 + $0x18] sm:$0xff]  ;;  %v3845_v49 = vlaneseq }
  0x24   : > { %s2126_s14 = smul.u32 48, %s2361_s13  ;;  %521 = vmatprep.mubr.f32.mxu0 %v2237_v6  ;;  %2174 = vset.pattern.permute.xlu1 %v2238_v7  ;;  %v570_v10 = vld [vmem:[%s3835_s3] sm:$0xff]  ;;  %v571_v16 = vld [vmem:[%s3835_s3 + $0x8] sm:$0xff]  ;;  %vm425_vm1 = vcmask 162816   ;;  %v577_v22 = vld [vmem:[%s3835_s3 + $0x38] sm:$0xff]  ;;  %s2099_s28 = sshll.u32 %s2324_s9, 1 }
  0x25   : > { %2173 = vset.pattern.permute.xlu0 %v2238_v7  ;;  %590 = vperm.xlu1 %2174, %v572_v8   ;;  %v411_v18 = vld [vmem:[%s3834_s2] sm:$0xff]  ;;  %v575_v19 = vld [vmem:[%s3835_s3 + $0x28] sm:$0xff]  ;;  %v576_v23 = vld [vmem:[%s3835_s3 + $0x30] sm:$0xff]  ;;  %p405_p13 = scmp.lt.s32.totalorder %s2099_s28, 3  ;;  %v2473_v51 = vshrl.u32 %v3845_v49, 7  ;;  %s2239_s12 = smov 2  }
  0x26   : > { %s364_s29 = scalar_lea.vmem [#allocation3], %s2126_s14  ;;  %580 = vperm.xlu0 %2173, %v570_v10   ;;  %v574_v20 = vld [vmem:[%s3835_s3 + $0x20] sm:$0xff]  ;;  %v412_v21 = vld [vmem:[%s3834_s2 + $0x8] sm:$0xff]  ;;  %v413_v24 = vld [vmem:[%s3834_s2 + $0x10] sm:$0xff]  ;;  %s2240_s19 = smov 1   ;;  %vm963_vm6 = vcmask 523264  }
  0x27   : > { %v424_v11 = vld [vmem:[%s364_s29 + $0x28] sm:$0xf]  ;;  %v423_v12 = vld [vmem:[%s364_s29 + $0x20] sm:$0xf]  ;;  %v422_v13 = vld [vmem:[%s364_s29 + $0x18] sm:$0xff]  ;;  %s3896_s28 = smov (!%p405_p13, %s2099_s28), 3 }
  0x28   : > { %2100 = vmatprep.subr.msk.mxu0 %vm450_vm0, %v424_v11  ;;  %v421_v14 = vld [vmem:[%s364_s29 + $0x10] sm:$0xff]  ;;  %v420_v15 = vld [vmem:[%s364_s29 + $0x8] sm:$0xff]  ;;  %v419_v17 = vld [vmem:[%s364_s29] sm:$0xff]  ;;  %3862 = vst [vmem:[#allocation7_spill] sm:$0xff] %v2473_v51  ;;  %s407_s11 = scalar_lea.vmem %s3833_s1, %s3896_s28  ;;  %v717_v53 = vsub.s32 0, %v2473_v51  ;;  %v721_v58 = vsub.s32 1, %v2473_v51 }
  0x29   : > { %2101 = vmatpush1.msk.msra.mxu0 %vm450_vm0, %v423_v12  ;;  %595 = vperm.xlu1 %2174, %v573_v9   ;;  %v640_v25 = vld [vmem:[%s3836_s4 + $0x30] sm:$0xff]  ;;  %v641_v26 = vld [vmem:[%s3836_s4 + $0x38] sm:$0xff]  ;;  %v638_v28 = vld [vmem:[%s3836_s4 + $0x20] sm:$0xff]  ;;  %s2241_s14 = smov 127   ;;  %s3843_s21 = smov 126  }
  0x2a   : > { %485 = vmatprep.subr.mxu0 %v422_v13  ;;  %585 = vperm.xlu0 %2173, %v571_v16   ;;  %v414_v27 = vld [vmem:[%s3834_s2 + $0x18] sm:$0xff]  ;;  %v639_v29 = vld [vmem:[%s3836_s4 + $0x28] sm:$0xff]  ;;  %v415_v30 = vld [vmem:[%s3834_s2 + $0x20] sm:$0xff]  ;;  %s3863_s29 = smov 126   ;;  %s2004_s27 = scalar_lea.sflag [#allocation5], %s2361_s13 }
  0x2b   : > { %486 = vmatpush1.msra.mxu0 %v421_v14  ;;  %v636_v31 = vld [vmem:[%s3836_s4 + $0x10] sm:$0xff]  ;;  %v637_v32 = vld [vmem:[%s3836_s4 + $0x18] sm:$0xff]  ;;  %v416_v33 = vld [vmem:[%s3834_s2 + $0x28] sm:$0xff] }
  0x2c   : > { %487 = vmatprep.subr.mxu0 %v420_v15  ;;  %v634_v34 = vld [vmem:[%s3836_s4] sm:$0xff]  ;;  %v635_v35 = vld [vmem:[%s3836_s4 + $0x8] sm:$0xff]  ;;  %v417_v36 = vld [vmem:[%s3834_s2 + $0x30] sm:$0xff] }
  0x2d   : > { %488 = vmatpush1.msra.mxu0 %v419_v17  ;;  %605 = vperm.xlu1 %2174, %v575_v19   ;;  %v418_v37 = vld [vmem:[%s3834_s2 + $0x38] sm:$0xff]  ;;  %v410_v55 = vld [vmem:[%s407_s11] sm:$0x3] }
  0x2e   : > { %2102 = vmatmul.mubr.msk.f32.vlgmr.msra.gmra.mxu0 %vm425_vm1, %v411_v18  ;;  %600 = vperm.xlu0 %2173, %v574_v20   ;;  %v2480_v62 = vrot.slane %v410_v55, %v717_v53  ;;  %v2482_v3 = vrot.slane %v410_v55, %v721_v58 }
  0x2f   : > { %527 = vmatprep.mubr.f32.mxu0 %v2237_v6 }
  0x31   : > { %615 = vperm.xlu1 %2174, %v577_v22  }
  0x32   : > { %2103 = vmatmul.mubr.msk.f32.gmra.mxu0 %vm425_vm1, %v412_v21  ;;  %610 = vperm.xlu0 %2173, %v576_v23  }
  0x33   : > { %533 = vmatprep.mubr.f32.mxu0 %v2237_v6 }
  0x35   : > { %674 = vperm.xlu1 %2174, %v640_v25  }
  0x36   : > { %2104 = vmatmul.mubr.msk.f32.gmra.mxu0 %vm425_vm1, %v413_v24  ;;  %679 = vperm.xlu0 %2173, %v641_v26  }
  0x37   : > { %539 = vmatprep.mubr.f32.mxu0 %v2237_v6 }
  0x39   : > { %664 = vperm.xlu1 %2174, %v638_v28  }
  0x3a   : > { %2105 = vmatmul.mubr.msk.f32.gmra.mxu0 %vm425_vm1, %v414_v27  ;;  %669 = vperm.xlu0 %2173, %v639_v29  }
  0x3b   : > { %545 = vmatprep.mubr.f32.mxu0 %v2237_v6 }
  0x3d   : > { %654 = vperm.xlu1 %2174, %v636_v31  }
  0x3e   : > { %2106 = vmatmul.mubr.msk.f32.gmra.mxu0 %vm425_vm1, %v415_v30  ;;  %659 = vperm.xlu0 %2173, %v637_v32  }
  0x3f   : > { %551 = vmatprep.mubr.f32.mxu0 %v2237_v6 }
  0x41   : > { %644 = vperm.xlu1 %2174, %v634_v34  }
  0x42   : > { %2107 = vmatmul.mubr.msk.f32.gmra.mxu0 %vm425_vm1, %v416_v33  ;;  %649 = vperm.xlu0 %2173, %v635_v35  }
  0x43   : > { %557 = vmatprep.mubr.f32.mxu0 %v2237_v6 }
  0x46   : > { %2108 = vmatmul.mubr.msk.f32.gmra.mxu0 %vm425_vm1, %v417_v36 }
  0x47   : > { %563 = vmatprep.mubr.f32.mxu0 %v2237_v6 }
  0x4a   : > { %2109 = vmatmul.mubr.msk.f32.gmra.mxu0 %vm425_vm1, %v418_v37 }
  0x4b   : > { %1165 = vmatprep.mubr.f32.mxu0 %v2237_v6 }
  0xa0   : > { %v591_v38 = vpop.permute.xlu1 %590 }
  0xa1   : > { %v581_v39 = vpop.permute.xlu0 %580 }
  0xa4   : > { %v2453_v40 = vpop.permute.xlu1 %595 }
  0xa5   : > { %v586_v41 = vpop.permute.xlu0 %585 }
  0xa8   : > { %v2455_v42 = vpop.permute.xlu1 %605 }
  0xa9   : > { %v2457_v43 = vpop.permute.xlu0 %600 }
  0xac   : > { %v2459_v44 = vpop.permute.xlu1 %615 }
  0xad   : > { %v2461_v45 = vpop.permute.xlu0 %610 }
  0xb0   : > { %v2463_v46 = vpop.permute.xlu1 %674 }
  0xb1   : > { %v2466_v47 = vpop.permute.xlu0 %679 }
  0xb4   : > { %v2468_v48 = vpop.permute.xlu1 %664 }
  0xb5   : > { %v2470_v50 = vpop.permute.xlu0 %669 }
  0xb8   : > { %v655_v52 = vpop.permute.xlu1 %654 }
  0xb9   : > { %v660_v54 = vpop.permute.xlu0 %659 }
  0xbc   : > { %v645_v59 = vpop.permute.xlu1 %644 }
  0xbd   : > { %v650_v5 = vpop.permute.xlu0 %649 }
  0xee   : > { %v523_v56 = vpop.f32.mrf.mxu0 }
  0xef   : > { %v618_v57 = vmul.f32 %v581_v39, %v523_v56 }
  0xf0   : > { %v525_v60 = vpop.f32.mrf.mxu0 }
  0xf1   : > { %v682_v61 = vadd.f32 %v645_v59, %v618_v57  ;;  %v619_v63 = vmul.f32 %v581_v39, %v525_v60 }
  0xf2   : > { %v529_v0 = vpop.f32.mrf.mxu0 }
  0xf3   : > { %v698_v1 = vmax.f32 %v682_v61, 0.0  ;;  %v683_v2 = vadd.f32 %v645_v59, %v619_v63  ;;  %v620_v4 = vmul.f32 %v586_v41, %v529_v0 }
  0xf4   : > { %v531_v7 = vpop.f32.mrf.mxu0 }
  0xf5   : > { %v2485_v8 = vmul.f32 %v2480_v62, %v698_v1  ;;  %v699_v9 = vmax.f32 %v683_v2, 0.0  ;;  %v684_v10 = vadd.f32 %v650_v5, %v620_v4  ;;  %v621_v11 = vmul.f32 %v586_v41, %v531_v7 }
  0xf6   : > { %v535_v12 = vpop.f32.mrf.mxu0 }
  0xf7   : > { %v2488_v13 = vmul.f32 %v2482_v3, %v699_v9  ;;  %v700_v14 = vmax.f32 %v684_v10, 0.0  ;;  %v685_v15 = vadd.f32 %v650_v5, %v621_v11  ;;  %741 = vrot.lane.b32.xlu0 %v2485_v8, %s2239_s12  ;;  %v622_v17 = vmul.f32 %v591_v38, %v535_v12 }
  0xf8   : > { %v537_v16 = vpop.f32.mrf.mxu0 }
  0xf9   : > { %808 = vrot.lane.b32.xlu1 %v2488_v13, %s2240_s19  ;;  %v2495_v18 = vmul.f32 %v2480_v62, %v700_v14  ;;  %v701_v19 = vmax.f32 %v685_v15, 0.0  ;;  %v623_v20 = vmul.f32 %v591_v38, %v537_v16  ;;  %v686_v22 = vadd.f32 %v655_v52, %v622_v17 }
  0xfa   : > { %v541_v21 = vpop.f32.mrf.mxu0 }
  0xfb   : > { %792 = vrot.lane.b32.xlu0 %v2485_v8, %s2240_s19  ;;  %v2502_v23 = vmul.f32 %v2482_v3, %v701_v19  ;;  %v687_v24 = vadd.f32 %v655_v52, %v623_v20  ;;  %v624_v25 = vmul.f32 %v2453_v40, %v541_v21  ;;  %v702_v27 = vmax.f32 %v686_v22, 0.0 }
  0xfc   : > { %v543_v26 = vpop.f32.mrf.mxu0 }
  0xfd   : > { %743 = vrot.lane.b32.xlu1 %v2495_v18, %s2239_s12  ;;  %v703_v28 = vmax.f32 %v687_v24, 0.0  ;;  %v688_v29 = vadd.f32 %v660_v54, %v624_v25  ;;  %v625_v30 = vmul.f32 %v2453_v40, %v543_v26  ;;  %v2513_v32 = vmul.f32 %v2480_v62, %v702_v27  ;;  %v940_v24 = vld [vmem:[%s3837_s5 + $0x8] sm:$0xff] }
  0xfe   : > { %v547_v31 = vpop.f32.mrf.mxu0  ;;  %1052 = vmatprep.mubr.f32.mxu1 %v940_v24  ;;  %v1376_v24 = vld [vmem:[%s3840_s8 + $0x90] sm:$0xff] }
  0xff   : > { %757 = vrot.lane.b32.xlu0 %v2488_v13, %s2239_s12  ;;  %v2518_v33 = vmul.f32 %v2482_v3, %v703_v28  ;;  %v704_v34 = vmax.f32 %v688_v29, 0.0  ;;  %v689_v35 = vadd.f32 %v660_v54, %v625_v30  ;;  %v626_v37 = vmul.f32 %v2457_v43, %v547_v31  ;;  %v1214_v30 = vld [vmem:[%s3838_s6] sm:$0xff] }
 0x100   : > { %v549_v36 = vpop.f32.mrf.mxu0 }
 0x101   : > { %759 = vrot.lane.b32.xlu1 %v2502_v23, %s2239_s12  ;;  %v2526_v38 = vmul.f32 %v2480_v62, %v704_v34  ;;  %v705_v39 = vmax.f32 %v689_v35, 0.0  ;;  %v627_v40 = vmul.f32 %v2457_v43, %v549_v36  ;;  %v690_v52 = vadd.f32 %v2468_v48, %v626_v37  ;;  %v1215_v34 = vld [vmem:[%s3838_s6 + $0x8] sm:$0xff]  ;;  %v1216_v36 = vld [vmem:[%s3838_s6 + $0x10] sm:$0xff] }
 0x102   : > { %v553_v41 = vpop.f32.mrf.mxu0 }
 0x103   : > { %794 = vrot.lane.b32.xlu0 %v2495_v18, %s2240_s19  ;;  %v2535_v53 = vmul.f32 %v2482_v3, %v705_v39  ;;  %v691_v54 = vadd.f32 %v2468_v48, %v627_v40  ;;  %v628_v55 = vmul.f32 %v2455_v42, %v553_v41  ;;  %v706_v56 = vmax.f32 %v690_v52, 0.0  ;;  %v1217_v39 = vld [vmem:[%s3838_s6 + $0x18] sm:$0xff]  ;;  %v1218_v41 = vld [vmem:[%s3838_s6 + $0x20] sm:$0xff] }
 0x104   : > { %v555_v43 = vpop.f32.mrf.mxu0 }
 0x105   : > { %810 = vrot.lane.b32.xlu1 %v2502_v23, %s2240_s19  ;;  %v707_v57 = vmax.f32 %v691_v54, 0.0  ;;  %v692_v58 = vadd.f32 %v2470_v50, %v628_v55  ;;  %v629_v59 = vmul.f32 %v2455_v42, %v555_v43  ;;  %v2548_v48 = vmul.f32 %v2480_v62, %v706_v56  ;;  %v1219_v54 = vld [vmem:[%s3838_s6 + $0x28] sm:$0xff]  ;;  %v1220_v43 = vld [vmem:[%s3838_s6 + $0x30] sm:$0xff] }
 0x106   : > { %v559_v60 = vpop.f32.mrf.mxu0 }
 0x107   : > { %745 = vrot.lane.b32.xlu0 %v2513_v32, %s2239_s12  ;;  %v2553_v61 = vmul.f32 %v2482_v3, %v707_v57  ;;  %v708_v63 = vmax.f32 %v692_v58, 0.0  ;;  %v693_v0 = vadd.f32 %v2470_v50, %v629_v59  ;;  %v630_v1 = vmul.f32 %v2461_v45, %v559_v60  ;;  %v1221_v57 = vld [vmem:[%s3838_s6 + $0x38] sm:$0xff]  ;;  %v1278_v59 = vld [vmem:[%s3839_s7] sm:$0xff] }
 0x108   : > { %v561_v42 = vpop.f32.mrf.mxu0 }
 0x109   : > { %812 = vrot.lane.b32.xlu1 %v2518_v33, %s2240_s19  ;;  %v2562_v2 = vmul.f32 %v2480_v62, %v708_v63  ;;  %v709_v4 = vmax.f32 %v693_v0, 0.0  ;;  %v631_v5 = vmul.f32 %v2461_v45, %v561_v42  ;;  %v694_v50 = vadd.f32 %v2463_v46, %v630_v1  ;;  %v1279_v63 = vld [vmem:[%s3839_s7 + $0x8] sm:$0xff]  ;;  %v1280_v42 = vld [vmem:[%s3839_s7 + $0x10] sm:$0xff] }
 0x10a   : > { %v565_v7 = vpop.f32.mrf.mxu0 }
 0x10b   : > { %796 = vrot.lane.b32.xlu0 %v2513_v32, %s2240_s19  ;;  %v2571_v9 = vmul.f32 %v2482_v3, %v709_v4  ;;  %v695_v10 = vadd.f32 %v2463_v46, %v631_v5  ;;  %v632_v11 = vmul.f32 %v2459_v44, %v565_v7  ;;  %v710_v12 = vmax.f32 %v694_v50, 0.0  ;;  %v1281_v4 = vld [vmem:[%s3839_s7 + $0x18] sm:$0xff]  ;;  %v1282_v7 = vld [vmem:[%s3839_s7 + $0x20] sm:$0xff] }
 0x10c   : > { %v567_v45 = vpop.f32.mrf.mxu0 }
 0x10d   : > { %747 = vrot.lane.b32.xlu1 %v2526_v38, %s2239_s12  ;;  %v711_v14 = vmax.f32 %v695_v10, 0.0  ;;  %v696_v15 = vadd.f32 %v2466_v47, %v632_v11  ;;  %v633_v16 = vmul.f32 %v2459_v44, %v567_v45  ;;  %v2584_v46 = vmul.f32 %v2480_v62, %v710_v12  ;;  %v1283_v10 = vld [vmem:[%s3839_s7 + $0x28] sm:$0xff]  ;;  %v1284_v45 = vld [vmem:[%s3839_s7 + $0x30] sm:$0xff] }
 0x10f   : > { %761 = vrot.lane.b32.xlu0 %v2518_v33, %s2239_s12  ;;  %v2589_v17 = vmul.f32 %v2482_v3, %v711_v14  ;;  %v712_v19 = vmax.f32 %v696_v15, 0.0  ;;  %v697_v20 = vadd.f32 %v2466_v47, %v633_v16  ;;  %v1285_v14 = vld [vmem:[%s3839_s7 + $0x38] sm:$0xff]  ;;  %v1374_v16 = vld [vmem:[%s3840_s8 + $0x80] sm:$0xff] }
 0x111   : > { %763 = vrot.lane.b32.xlu1 %v2535_v53, %s2239_s12  ;;  %v2597_v44 = vmul.f32 %v2480_v62, %v712_v19  ;;  %v713_v21 = vmax.f32 %v697_v20, 0.0  ;;  %v1375_v20 = vld [vmem:[%s3840_s8 + $0x88] sm:$0xff] }
 0x113   : > { %798 = vrot.lane.b32.xlu0 %v2526_v38, %s2240_s19  ;;  %v2604_v22 = vmul.f32 %v2482_v3, %v713_v21 }
 0x115   : > { %814 = vrot.lane.b32.xlu1 %v2535_v53, %s2240_s19 }
 0x117   : > { %749 = vrot.lane.b32.xlu0 %v2548_v48, %s2239_s12 }
 0x119   : > { %816 = vrot.lane.b32.xlu1 %v2553_v61, %s2240_s19 }
 0x11b   : > { %800 = vrot.lane.b32.xlu0 %v2548_v48, %s2240_s19 }
 0x11d   : > { %751 = vrot.lane.b32.xlu1 %v2562_v2, %s2239_s12 }
 0x11f   : > { %765 = vrot.lane.b32.xlu0 %v2553_v61, %s2239_s12 }
 0x121   : > { %767 = vrot.lane.b32.xlu1 %v2571_v9, %s2239_s12 }
 0x123   : > { %802 = vrot.lane.b32.xlu0 %v2562_v2, %s2240_s19 }
 0x125   : > { %818 = vrot.lane.b32.xlu1 %v2571_v9, %s2240_s19 }
 0x127   : > { %753 = vrot.lane.b32.xlu0 %v2584_v46, %s2239_s12 }
 0x129   : > { %820 = vrot.lane.b32.xlu1 %v2589_v17, %s2240_s19 }
 0x12b   : > { %804 = vrot.lane.b32.xlu0 %v2584_v46, %s2240_s19 }
 0x12d   : > { %755 = vrot.lane.b32.xlu1 %v2597_v44, %s2239_s12 }
 0x12f   : > { %769 = vrot.lane.b32.xlu0 %v2589_v17, %s2239_s12 }
 0x131   : > { %771 = vrot.lane.b32.xlu1 %v2604_v22, %s2239_s12 }
 0x133   : > { %806 = vrot.lane.b32.xlu0 %v2597_v44, %s2240_s19 }
 0x135   : > { %822 = vrot.lane.b32.xlu1 %v2604_v22, %s2240_s19 }
 0x137   : > { %853 = vrot.lane.b32.xlu0 %v2584_v46, %s2241_s14 }
 0x139   : > { %869 = vrot.lane.b32.xlu1 %v2589_v17, %s2241_s14 }
 0x13b   : > { %855 = vrot.lane.b32.xlu0 %v2597_v44, %s2241_s14 }
 0x13d   : > { %867 = vrot.lane.b32.xlu1 %v2571_v9, %s2241_s14 }
 0x13f   : > { %851 = vrot.lane.b32.xlu0 %v2562_v2, %s2241_s14 }
 0x141   : > { %865 = vrot.lane.b32.xlu1 %v2553_v61, %s2241_s14 }
 0x143   : > { %849 = vrot.lane.b32.xlu0 %v2548_v48, %s2241_s14 }
 0x145   : > { %863 = vrot.lane.b32.xlu1 %v2535_v53, %s2241_s14 }
 0x147   : > { %847 = vrot.lane.b32.xlu0 %v2526_v38, %s2241_s14 }
 0x149   : > { %861 = vrot.lane.b32.xlu1 %v2518_v33, %s2241_s14 }
 0x14b   : > { %845 = vrot.lane.b32.xlu0 %v2513_v32, %s2241_s14 }
 0x14d   : > { %859 = vrot.lane.b32.xlu1 %v2502_v23, %s2241_s14 }
 0x14f   : > { %843 = vrot.lane.b32.xlu0 %v2495_v18, %s2241_s14 }
 0x151   : > { %857 = vrot.lane.b32.xlu1 %v2488_v13, %s2241_s14 }
 0x153   : > { %841 = vrot.lane.b32.xlu0 %v2485_v8, %s2241_s14 }
 0x155   : > { %871 = vrot.lane.b32.xlu1 %v2604_v22, %s2241_s14 }
 0x157   : > { %904 = vrot.lane.b32.xlu0 %v2597_v44, %s3843_s21 }
 0x159   : > { %918 = vrot.lane.b32.xlu1 %v2589_v17, %s3843_s21 }
 0x15b   : > { %902 = vrot.lane.b32.xlu0 %v2584_v46, %s3843_s21 }
 0x15d   : > { %916 = vrot.lane.b32.xlu1 %v2571_v9, %s3843_s21 }
 0x15f   : > { %900 = vrot.lane.b32.xlu0 %v2562_v2, %s3843_s21 }
 0x161   : > { %914 = vrot.lane.b32.xlu1 %v2553_v61, %s3843_s21 }
 0x163   : > { %898 = vrot.lane.b32.xlu0 %v2548_v48, %s3843_s21 }
 0x165   : > { %920 = vrot.lane.b32.xlu1 %v2604_v22, %s3843_s21 }
 0x167   : > { %896 = vrot.lane.b32.xlu0 %v2526_v38, %s3843_s21 }
 0x169   : > { %v2664_v47 = vpop.permute.xlu0 %741  ;;  %912 = vrot.lane.b32.xlu1 %v2535_v53, %s3843_s21 }
 0x16b   : > { %v2671_v25 = vpop.permute.xlu1 %808  ;;  %894 = vrot.lane.b32.xlu0 %v2513_v32, %s3843_s21 }
 0x16d   : > { %v2675_v26 = vpop.permute.xlu0 %792  ;;  %910 = vrot.lane.b32.xlu1 %v2518_v33, %s3843_s21 }
 0x16f   : > { %v2679_v27 = vpop.permute.xlu1 %743  ;;  %892 = vrot.lane.b32.xlu0 %v2495_v18, %s3843_s21 }
 0x171   : > { %v2683_v28 = vpop.permute.xlu0 %757  ;;  %908 = vrot.lane.b32.xlu1 %v2502_v23, %s3843_s21 }
 0x173   : > { %v2687_v29 = vpop.permute.xlu1 %759  ;;  %890 = vrot.lane.b32.xlu0 %v2485_v8, %s3843_s21 }
 0x175   : > { %v2694_v31 = vpop.permute.xlu0 %794  ;;  %906 = vrot.lane.b32.xlu1 %v2488_v13, %s3843_s21 }
 0x177   : > { %v2701_v35 = vpop.permute.xlu1 %810  ;;  %1224 = vperm.xlu0 %2173, %v1214_v30  }
 0x179   : > { %v2706_v37 = vpop.permute.xlu0 %745  ;;  %1229 = vperm.xlu1 %2174, %v1215_v34   ;;  %v1377_v34 = vld [vmem:[%s3840_s8 + $0x98] sm:$0xff] }
 0x17b   : > { %v2711_v40 = vpop.permute.xlu1 %812  ;;  %1234 = vperm.xlu0 %2173, %v1216_v36  }
 0x17d   : > { %v2716_v52 = vpop.permute.xlu0 %796  ;;  %1239 = vperm.xlu1 %2174, %v1217_v39   ;;  %v1378_v39 = vld [vmem:[%s3840_s8 + $0xa0] sm:$0xff] }
 0x17f   : > { %v2721_v55 = vpop.permute.xlu1 %747  ;;  %1244 = vperm.xlu0 %2173, %v1218_v41  }
 0x181   : > { %v2726_v56 = vpop.permute.xlu0 %761  ;;  %1249 = vperm.xlu1 %2174, %v1219_v54   ;;  %v1379_v54 = vld [vmem:[%s3840_s8 + $0xa8] sm:$0xff] }
 0x183   : > { %v2731_v58 = vpop.permute.xlu1 %763  ;;  %1254 = vperm.xlu0 %2173, %v1220_v43  }
 0x185   : > { %v2736_v60 = vpop.permute.xlu0 %798  ;;  %1259 = vperm.xlu1 %2174, %v1221_v57   ;;  %v1380_v57 = vld [vmem:[%s3840_s8 + $0xb0] sm:$0xff] }
 0x187   : > { %v2741_v0 = vpop.permute.xlu1 %814  ;;  %1288 = vperm.xlu0 %2173, %v1278_v59  }
 0x189   : > { %v2746_v1 = vpop.permute.xlu0 %749  ;;  %1293 = vperm.xlu1 %2174, %v1279_v63   ;;  %v1381_v63 = vld [vmem:[%s3840_s8 + $0xb8] sm:$0xff] }
 0x18b   : > { %v2751_v5 = vpop.permute.xlu1 %816  ;;  %1298 = vperm.xlu0 %2173, %v1280_v42   ;;  %v2804_v42 = vand.u32 127, %v3845_v49 }
 0x18d   : > { %v2756_v50 = vpop.permute.xlu0 %800  ;;  %1303 = vperm.xlu1 %2174, %v1281_v4   ;;  %vm824_vm2 = vcmp.lt.s32.totalorder %v2804_v42, 1  ;;  %vm775_vm3 = vcmp.lt.s32.totalorder %v2804_v42, 2  ;;  %vm873_vm4 = vcmp.lt.s32.totalorder %v2804_v42, 127  ;;  %vm922_vm5 = vcmp.lt.s32.totalorder %v2804_v42, 126 }
 0x18f   : > { %v2761_v11 = vpop.permute.xlu1 %751  ;;  %1308 = vperm.xlu0 %2173, %v1282_v7   ;;  %v1486_v7 = vld [vmem:[%s3840_s8] sm:$0xff] }
 0x191   : > { %v2766_v12 = vpop.permute.xlu0 %765  ;;  %1313 = vperm.xlu1 %2174, %v1283_v10  }
 0x193   : > { %v2771_v15 = vpop.permute.xlu1 %767  ;;  %1318 = vperm.xlu0 %2173, %v1284_v45   ;;  %v1487_v45 = vld [vmem:[%s3840_s8 + $0x8] sm:$0xff] }
 0x195   : > { %v803_v19 = vpop.permute.xlu0 %802  ;;  %1323 = vperm.xlu1 %2174, %v1285_v14  }
 0x197   : > { %v819_v21 = vpop.permute.xlu1 %818  ;;  %1384 = vperm.xlu0 %2173, %v1374_v16  }
 0x199   : > { %v2782_v30 = vpop.permute.xlu0 %753  ;;  %1389 = vperm.xlu1 %2174, %v1375_v20  }
 0x19b   : > { %v821_v36 = vpop.permute.xlu1 %820  ;;  %1394 = vperm.xlu0 %2173, %v1376_v24   ;;  %v1488_v24 = vld [vmem:[%s3840_s8 + $0x10] sm:$0xff] }
 0x19d   : > { %v805_v41 = vpop.permute.xlu0 %804  ;;  %1399 = vperm.xlu1 %2174, %v1377_v34  }
 0x19f   : > { %1404 = vperm.xlu0 %2173, %v1378_v39   ;;  %v2793_v43 = vpop.permute.xlu1 %755  ;;  %v831_v39 = vsel %vm824_vm2, %v805_v41, %v821_v36 }
 0x1a1   : > { %v2798_v59 = vpop.permute.xlu0 %769  ;;  %1409 = vperm.xlu1 %2174, %v1379_v54   ;;  %v1489_v54 = vld [vmem:[%s3840_s8 + $0x18] sm:$0xff] }
 0x1a3   : > { %1414 = vperm.xlu0 %2173, %v1380_v57   ;;  %v2806_v4 = vpop.permute.xlu1 %771 }
 0x1a5   : > { %v807_v10 = vpop.permute.xlu0 %806  ;;  %1419 = vperm.xlu1 %2174, %v1381_v63   ;;  %v839_v63 = vsel %vm824_vm2, %v821_v36, %v805_v41  ;;  %v829_v36 = vsel %vm824_vm2, %v2756_v50, %v2751_v5  ;;  %v1491_v41 = vld [vmem:[%s3840_s8 + $0x28] sm:$0xff] }
 0x1a7   : > { %1496 = vperm.xlu0 %2173, %v1486_v7   ;;  %v823_v14 = vpop.permute.xlu1 %822  ;;  %v830_v7 = vsel %vm824_vm2, %v803_v19, %v819_v21 }
 0x1a8   : > { %v832_v16 = vsel %vm824_vm2, %v807_v10, %v823_v14  ;;  %v840_v20 = vsel %vm824_vm2, %v823_v14, %v807_v10  ;;  %v1490_v10 = vld [vmem:[%s3840_s8 + $0x20] sm:$0xff]  ;;  %v838_v14 = vsel %vm824_vm2, %v819_v21, %v803_v19  ;;  %v828_v19 = vsel %vm824_vm2, %v2736_v60, %v2741_v0  ;;  %v1492_v21 = vld [vmem:[%s3840_s8 + $0x30] sm:$0xff] }
 0x1a9   : > { %v2822_v34 = vpop.permute.xlu0 %853  ;;  %1501 = vperm.xlu1 %2174, %v1487_v45   ;;  %988 = vmatprep.subr.mxu1 %v832_v16 }
 0x1aa   : > { %989 = vmatpush1.msra.mxu1 %v840_v20  ;;  %v837_v20 = vsel %vm824_vm2, %v2751_v5, %v2756_v50  ;;  %v827_v5 = vsel %vm824_vm2, %v2716_v52, %v2711_v40  ;;  %v1493_v50 = vld [vmem:[%s3840_s8 + $0x38] sm:$0xff] }
 0x1ab   : > { %1506 = vperm.xlu0 %2173, %v1488_v24   ;;  %990 = vmatprep.subr.mxu1 %v831_v39  ;;  %v2829_v57 = vpop.permute.xlu1 %869  ;;  %v836_v39 = vsel %vm824_vm2, %v2741_v0, %v2736_v60  ;;  %v826_v60 = vsel %vm824_vm2, %v2694_v31, %v2701_v35  ;;  %v1614_v0 = vld [vmem:[%s3840_s8 + $0x40] sm:$0xff] }
 0x1ac   : > { %991 = vmatpush1.msra.mxu1 %v839_v63  ;;  %v835_v63 = vsel %vm824_vm2, %v2711_v40, %v2716_v52  ;;  %v825_v40 = vsel %vm824_vm2, %v2675_v26, %v2671_v25  ;;  %v1615_v52 = vld [vmem:[%s3840_s8 + $0x48] sm:$0xff] }
 0x1ad   : > { %v2838_v45 = vpop.permute.xlu0 %855  ;;  %1511 = vperm.xlu1 %2174, %v1489_v54   ;;  %992 = vmatprep.subr.mxu1 %v830_v7 }
 0x1ae   : > { %993 = vmatpush1.msra.mxu1 %v838_v14 }
 0x1af   : > { %1516 = vperm.xlu0 %2173, %v1490_v10   ;;  %994 = vmatprep.subr.mxu1 %v829_v36  ;;  %v2849_v16 = vpop.permute.xlu1 %867  ;;  %v834_v10 = vsel %vm824_vm2, %v2701_v35, %v2694_v31  ;;  %v833_v31 = vsel %vm824_vm2, %v2671_v25, %v2675_v26  ;;  %v783_v35 = vsel %vm775_vm3, %v2793_v43, %v2806_v4  ;;  %v1616_v36 = vld [vmem:[%s3840_s8 + $0x50] sm:$0xff]  ;;  %v1617_v26 = vld [vmem:[%s3840_s8 + $0x58] sm:$0xff] }
 0x1b0   : > { %995 = vmatpush1.msra.mxu1 %v837_v20  ;;  %v791_v20 = vsel %vm775_vm3, %v2806_v4, %v2793_v43  ;;  %v782_v25 = vsel %vm775_vm3, %v2782_v30, %v2798_v59  ;;  %v781_v43 = vsel %vm775_vm3, %v2761_v11, %v2771_v15  ;;  %v1618_v4 = vld [vmem:[%s3840_s8 + $0x60] sm:$0xff] }
 0x1b1   : > { %v2862_v24 = vpop.permute.xlu0 %851  ;;  %1521 = vperm.xlu1 %2174, %v1491_v41   ;;  %996 = vmatprep.subr.mxu1 %v828_v19 }
 0x1b2   : > { %997 = vmatpush1.msra.mxu1 %v836_v39 }
 0x1b3   : > { %1526 = vperm.xlu0 %2173, %v1492_v21   ;;  %998 = vmatprep.subr.mxu1 %v827_v5  ;;  %v2875_v54 = vpop.permute.xlu1 %865  ;;  %v790_v21 = vsel %vm775_vm3, %v2798_v59, %v2782_v30  ;;  %v789_v5 = vsel %vm775_vm3, %v2771_v15, %v2761_v11  ;;  %v780_v30 = vsel %vm775_vm3, %v2746_v1, %v2766_v12  ;;  %v1619_v59 = vld [vmem:[%s3840_s8 + $0x68] sm:$0xff]  ;;  %v1620_v15 = vld [vmem:[%s3840_s8 + $0x70] sm:$0xff] }
 0x1b4   : > { %999 = vmatpush1.msra.mxu1 %v835_v63  ;;  %v788_v63 = vsel %vm775_vm3, %v2766_v12, %v2746_v1  ;;  %v779_v11 = vsel %vm775_vm3, %v2721_v55, %v2731_v58  ;;  %v778_v1 = vsel %vm775_vm3, %v2706_v37, %v2726_v56  ;;  %v1621_v12 = vld [vmem:[%s3840_s8 + $0x78] sm:$0xff] }
 0x1b5   : > { %v2888_v7 = vpop.permute.xlu0 %849  ;;  %1531 = vperm.xlu1 %2174, %v1493_v50   ;;  %1000 = vmatprep.subr.mxu1 %v826_v60 }
 0x1b6   : > { %1001 = vmatpush1.msra.mxu1 %v834_v10 }
 0x1b7   : > { %1624 = vperm.xlu0 %2173, %v1614_v0   ;;  %1002 = vmatprep.subr.mxu1 %v825_v40  ;;  %v2902_v14 = vpop.permute.xlu1 %863  ;;  %v787_v0 = vsel %vm775_vm3, %v2731_v58, %v2721_v55  ;;  %v786_v40 = vsel %vm775_vm3, %v2726_v56, %v2706_v37  ;;  %v777_v55 = vsel %vm775_vm3, %v2679_v27, %v2687_v29  ;;  %v1742_v58 = vld [vmem:[%s3840_s8 + $0xc0] sm:$0xff]  ;;  %v1743_v56 = vld [vmem:[%s3840_s8 + $0xc8] sm:$0xff] }
 0x1b8   : > { %1003 = vmatpush1.msra.mxu1 %v833_v31  ;;  %v785_v31 = vsel %vm775_vm3, %v2687_v29, %v2679_v27  ;;  %v776_v37 = vsel %vm775_vm3, %v2664_v47, %v2683_v28  ;;  %v784_v27 = vsel %vm775_vm3, %v2683_v28, %v2664_v47  ;;  %v888_v47 = vsel %vm873_vm4, %v2829_v57, %v2822_v34  ;;  %v1870_v28 = vld [vmem:[%s3840_s8 + $0x100] sm:$0xff] }
 0x1b9   : > { %v2915_v41 = vpop.permute.xlu0 %847  ;;  %1629 = vperm.xlu1 %2174, %v1615_v52   ;;  %1004 = vmatprep.subr.mxu1 %v783_v35 }
 0x1ba   : > { %1005 = vmatpush1.msra.mxu1 %v791_v20  ;;  %v1744_v20 = vld [vmem:[%s3840_s8 + $0xd0] sm:$0xff] }
 0x1bb   : > { %1634 = vperm.xlu0 %2173, %v1616_v36   ;;  %1006 = vmatprep.subr.mxu1 %v782_v25  ;;  %v2928_v19 = vpop.permute.xlu1 %861 }
 0x1bc   : > { %1007 = vmatpush1.msra.mxu1 %v790_v21  ;;  %v887_v21 = vsel %vm873_vm4, %v2849_v16, %v2862_v24 }
 0x1bd   : > { %v2941_v39 = vpop.permute.xlu0 %845  ;;  %1639 = vperm.xlu1 %2174, %v1617_v26   ;;  %1008 = vmatprep.subr.mxu1 %v781_v43  ;;  %v880_v26 = vsel %vm873_vm4, %v2822_v34, %v2829_v57  ;;  %v1871_v43 = vld [vmem:[%s3840_s8 + $0x108] sm:$0xff]  ;;  %v886_v34 = vsel %vm873_vm4, %v2875_v54, %v2888_v7  ;;  %v1745_v57 = vld [vmem:[%s3840_s8 + $0xd8] sm:$0xff] }
 0x1be   : > { %1009 = vmatpush1.msra.mxu1 %v789_v5  ;;  %v879_v5 = vsel %vm873_vm4, %v2862_v24, %v2849_v16  ;;  %v885_v16 = vsel %vm873_vm4, %v2902_v14, %v2915_v41  ;;  %v1872_v24 = vld [vmem:[%s3840_s8 + $0x110] sm:$0xff] }
 0x1bf   : > { %1644 = vperm.xlu0 %2173, %v1618_v4   ;;  %1010 = vmatprep.subr.mxu1 %v780_v30  ;;  %v2954_v50 = vpop.permute.xlu1 %859 }
 0x1c0   : > { %1011 = vmatpush1.msra.mxu1 %v788_v63 }
 0x1c1   : > { %v2967_v60 = vpop.permute.xlu0 %843  ;;  %1649 = vperm.xlu1 %2174, %v1619_v59   ;;  %1012 = vmatprep.subr.mxu1 %v779_v11  ;;  %v878_v59 = vsel %vm873_vm4, %v2888_v7, %v2875_v54  ;;  %v877_v11 = vsel %vm873_vm4, %v2915_v41, %v2902_v14  ;;  %v884_v54 = vsel %vm873_vm4, %v2928_v19, %v2941_v39  ;;  %v1746_v7 = vld [vmem:[%s3840_s8 + $0xe0] sm:$0xff]  ;;  %v1873_v41 = vld [vmem:[%s3840_s8 + $0x118] sm:$0xff] }
 0x1c2   : > { %1013 = vmatpush1.msra.mxu1 %v787_v0  ;;  %v876_v0 = vsel %vm873_vm4, %v2941_v39, %v2928_v19  ;;  %v883_v14 = vsel %vm873_vm4, %v2954_v50, %v2967_v60  ;;  %v1747_v39 = vld [vmem:[%s3840_s8 + $0xe8] sm:$0xff] }
 0x1c3   : > { %1654 = vperm.xlu0 %2173, %v1620_v15   ;;  %1014 = vmatprep.subr.mxu1 %v778_v1  ;;  %v2980_v10 = vpop.permute.xlu1 %857 }
 0x1c4   : > { %1015 = vmatpush1.msra.mxu1 %v786_v40 }
 0x1c5   : > { %v2993_v52 = vpop.permute.xlu0 %841  ;;  %1659 = vperm.xlu1 %2174, %v1621_v12   ;;  %1016 = vmatprep.subr.mxu1 %v777_v55  ;;  %v875_v12 = vsel %vm873_vm4, %v2967_v60, %v2954_v50 }
 0x1c6   : > { %1017 = vmatpush1.msra.mxu1 %v785_v31  ;;  %v882_v19 = vsel %vm873_vm4, %v2980_v10, %v2993_v52  ;;  %v874_v50 = vsel %vm873_vm4, %v2993_v52, %v2980_v10 }
 0x1c7   : > { %1752 = vperm.xlu0 %2173, %v1742_v58   ;;  %1018 = vmatprep.subr.mxu1 %v776_v37  ;;  %v872_v35 = vpop.permute.xlu1 %871  ;;  %v1874_v58 = vld [vmem:[%s3840_s8 + $0x120] sm:$0xff]  ;;  %v1875_v37 = vld [vmem:[%s3840_s8 + $0x128] sm:$0xff] }
 0x1c8   : > { %1019 = vmatpush1.msra.mxu1 %v784_v27  ;;  %v889_v29 = vsel %vm873_vm4, %v872_v35, %v2838_v45  ;;  %v881_v36 = vsel %vm873_vm4, %v2838_v45, %v872_v35 }
 0x1c9   : > { %v905_v25 = vpop.permute.xlu0 %904  ;;  %1757 = vperm.xlu1 %2174, %v1743_v56   ;;  %1020 = vmatprep.subr.mxu1 %v889_v29  ;;  %v1749_v29 = vld [vmem:[%s3840_s8 + $0xf8] sm:$0xff] }
 0x1ca   : > { %1021 = vmatpush2.msra.mxu1 %v881_v36  ;;  %v1876_v36 = vld [vmem:[%s3840_s8 + $0x130] sm:$0xff] }
 0x1cb   : > { %1762 = vperm.xlu0 %2173, %v1744_v20   ;;  %1022 = vmatprep.subr.mxu1 %v888_v47  ;;  %v919_v45 = vpop.permute.xlu1 %918 }
 0x1cc   : > { %1023 = vmatpush2.msra.mxu1 %v880_v26 }
 0x1cd   : > { %v903_v4 = vpop.permute.xlu0 %902  ;;  %1880 = vperm.xlu1 %2174, %v1870_v28   ;;  %1024 = vmatprep.subr.mxu1 %v887_v21 }
 0x1ce   : > { %1025 = vmatpush2.msra.mxu1 %v879_v5  ;;  %v937_v10 = vsel %vm922_vm5, %v919_v45, %v903_v4  ;;  %v929_v56 = vsel %vm922_vm5, %v903_v4, %v919_v45  ;;  %v1877_v45 = vld [vmem:[%s3840_s8 + $0x138] sm:$0xff]  ;;  %v945_v4 = vld [vmem:[%s3837_s5 + $0x30] sm:$0xff]  ;;  %v947_v5 = vld [vmem:[%s3837_s5 + $0x40] sm:$0xff] }
 0x1cf   : > { %1885 = vperm.xlu0 %2173, %v1871_v43   ;;  %1026 = vmatprep.subr.mxu1 %v886_v34  ;;  %v917_v30 = vpop.permute.xlu1 %916  ;;  %v944_v43 = vld [vmem:[%s3837_s5 + $0x28] sm:$0xff]  ;;  %v949_v34 = vld [vmem:[%s3837_s5 + $0x50] sm:$0xff] }
 0x1d0   : > { %1027 = vmatpush2.msra.mxu1 %v878_v59  ;;  %v952_v59 = vld [vmem:[%s3837_s5 + $0x68] sm:$0xff] }
 0x1d1   : > { %v901_v63 = vpop.permute.xlu0 %900  ;;  %1767 = vperm.xlu1 %2174, %v1745_v57   ;;  %1028 = vmatprep.subr.mxu1 %v885_v16  ;;  %v948_v57 = vld [vmem:[%s3837_s5 + $0x48] sm:$0xff]  ;;  %v951_v16 = vld [vmem:[%s3837_s5 + $0x60] sm:$0xff] }
 0x1d2   : > { %1029 = vmatpush2.msra.mxu1 %v877_v11  ;;  %v936_v35 = vsel %vm922_vm5, %v917_v30, %v901_v63  ;;  %v954_v11 = vld [vmem:[%s3837_s5 + $0x78] sm:$0xff] }
 0x1d3   : > { %1890 = vperm.xlu0 %2173, %v1872_v24   ;;  %1030 = vmatprep.subr.mxu1 %v884_v54  ;;  %v915_v15 = vpop.permute.xlu1 %914  ;;  %v953_v24 = vld [vmem:[%s3837_s5 + $0x70] sm:$0xff]  ;;  %v956_v54 = vld [vmem:[%s3837_s5 + $0x88] sm:$0xff] }
 0x1d4   : > { %1031 = vmatpush2.msra.mxu1 %v876_v0  ;;  %v959_v0 = vld [vmem:[%s3837_s5 + $0xa0] sm:$0xff] }
 0x1d5   : > { %v899_v1 = vpop.permute.xlu0 %898  ;;  %1772 = vperm.xlu1 %2174, %v1746_v7   ;;  %1032 = vmatprep.subr.mxu1 %v883_v14  ;;  %v958_v7 = vld [vmem:[%s3837_s5 + $0x98] sm:$0xff]  ;;  %v961_v14 = vld [vmem:[%s3837_s5 + $0xb0] sm:$0xff] }
 0x1d6   : > { %1033 = vmatpush2.msra.mxu1 %v875_v12 }
 0x1d7   : > { %1895 = vperm.xlu0 %2173, %v1873_v41   ;;  %1034 = vmatprep.subr.mxu1 %v882_v19  ;;  %v921_v40 = vpop.permute.xlu1 %920  ;;  %v960_v41 = vld [vmem:[%s3837_s5 + $0xa8] sm:$0xff] }
 0x1d8   : > { %1035 = vmatpush2.msra.mxu1 %v874_v50  ;;  %v938_v60 = vsel %vm922_vm5, %v921_v40, %v905_v25  ;;  %v930_v55 = vsel %vm922_vm5, %v905_v25, %v921_v40 }
 0x1d9   : > { %v897_v31 = vpop.permute.xlu0 %896  ;;  %1777 = vperm.xlu1 %2174, %v1747_v39   ;;  %1036 = vmatprep.subr.mxu1 %v2604_v22  ;;  %v1748_v22 = vld [vmem:[%s3840_s8 + $0xf0] sm:$0xff] }
 0x1da   : > { %1117 = vmatprep.subr.mxu0 %v938_v60  ;;  %1037 = vmatpush2.msra.mxu1 %v2597_v44 }
 0x1db   : > { %1118 = vmatpush1.msra.mxu0 %v930_v55  ;;  %1900 = vperm.xlu0 %2173, %v1874_v58   ;;  %v913_v52 = vpop.permute.xlu1 %912 }
 0x1dc   : > { %1038 = vmatprep.subr.mxu1 %v2589_v17  ;;  %1119 = vmatprep.subr.mxu0 %v937_v10  ;;  %v928_v17 = vsel %vm922_vm5, %v901_v63, %v917_v30  ;;  %v934_v20 = vsel %vm922_vm5, %v913_v52, %v897_v31  ;;  %v950_v30 = vld [vmem:[%s3837_s5 + $0x58] sm:$0xff]  ;;  %v955_v63 = vld [vmem:[%s3837_s5 + $0x80] sm:$0xff] }
 0x1dd   : > { %1039 = vmatpush2.msra.mxu1 %v2584_v46  ;;  %1120 = vmatpush1.msra.mxu0 %v929_v56  ;;  %v895_v44 = vpop.permute.xlu0 %894  ;;  %v935_v46 = vsel %vm922_vm5, %v915_v15, %v899_v1 }
 0x1de   : > { %1905 = vperm.xlu1 %2174, %v1875_v37   ;;  %1040 = vmatprep.subr.mxu1 %v2571_v9  ;;  %v927_v9 = vsel %vm922_vm5, %v899_v1, %v915_v15  ;;  %v957_v15 = vld [vmem:[%s3837_s5 + $0x90] sm:$0xff]  ;;  %v962_v1 = vld [vmem:[%s3837_s5 + $0xb8] sm:$0xff] }
 0x1df   : > { %1121 = vmatprep.subr.mxu0 %v936_v35  ;;  %1041 = vmatpush2.msra.mxu1 %v2562_v2  ;;  %v911_v27 = vpop.permute.xlu1 %910 }
 0x1e0   : > { %1122 = vmatpush1.msra.mxu0 %v928_v17  ;;  %1782 = vperm.xlu0 %2173, %v1748_v22  }
 0x1e1   : > { %1042 = vmatprep.subr.mxu1 %v2553_v61  ;;  %1123 = vmatprep.subr.mxu0 %v935_v46  ;;  %v893_v2 = vpop.permute.xlu0 %892  ;;  %v926_v61 = vsel %vm922_vm5, %v897_v31, %v913_v52 }
 0x1e2   : > { %1043 = vmatpush2.msra.mxu1 %v2548_v48  ;;  %1124 = vmatpush1.msra.mxu0 %v927_v9  ;;  %v933_v48 = vsel %vm922_vm5, %v911_v27, %v895_v44 }
 0x1e3   : > { %1787 = vperm.xlu1 %2174, %v1749_v29   ;;  %1044 = vmatprep.subr.mxu1 %v2535_v53  ;;  %v909_v25 = vpop.permute.xlu1 %908  ;;  %v925_v53 = vsel %vm922_vm5, %v895_v44, %v911_v27 }
 0x1e4   : > { %1125 = vmatprep.subr.mxu0 %v934_v20  ;;  %1045 = vmatpush2.msra.mxu1 %v2526_v38  ;;  %v932_v47 = vsel %vm922_vm5, %v909_v25, %v893_v2  ;;  %v924_v38 = vsel %vm922_vm5, %v893_v2, %v909_v25 }
 0x1e5   : > { %1126 = vmatpush1.msra.mxu0 %v926_v61  ;;  %1910 = vperm.xlu0 %2173, %v1876_v36   ;;  %v891_v28 = vpop.permute.xlu0 %890 }
 0x1e6   : > { %1046 = vmatprep.subr.mxu1 %v2518_v33  ;;  %1127 = vmatprep.subr.mxu0 %v933_v48 }
 0x1e7   : > { %1047 = vmatpush2.msra.mxu1 %v2513_v32  ;;  %1128 = vmatpush1.msra.mxu0 %v925_v53  ;;  %v907_v26 = vpop.permute.xlu1 %906  ;;  %v939_v32 = vld [vmem:[%s3837_s5] sm:$0xff] }
 0x1e8   : > { %1048 = vmatprep.subr.mxu1 %v2502_v23  ;;  %1129 = vmatprep.subr.mxu0 %v932_v47  ;;  %v931_v33 = vsel %vm922_vm5, %v907_v26, %v891_v28  ;;  %v923_v21 = vsel %vm922_vm5, %v891_v28, %v907_v26  ;;  %v941_v23 = vld [vmem:[%s3837_s5 + $0x10] sm:$0xff] }
 0x1e9   : > { %1049 = vmatpush2.msra.mxu1 %v2495_v18  ;;  %1130 = vmatpush1.msra.mxu0 %v924_v38  ;;  %v943_v18 = vld [vmem:[%s3837_s5 + $0x20] sm:$0xff] }
 0x1ea   : > { %1915 = vperm.xlu0 %2173, %v1877_v45   ;;  %1050 = vmatprep.subr.mxu1 %v2488_v13  ;;  %v942_v13 = vld [vmem:[%s3837_s5 + $0x18] sm:$0xff] }
 0x1eb   : > { %1051 = vmatpush2.msra.mxu1 %v2485_v8  ;;  %1131 = vmatprep.subr.mxu0 %v931_v33  ;;  %v946_v8 = vld [vmem:[%s3837_s5 + $0x38] sm:$0xff] }
 0x1ec   : > { %1132 = vmatpush1.msra.mxu0 %v923_v21  ;;  %1053 = vmatmul.mubr.f32.vlgmr.msra.gmra.mxu1 %v939_v32 }
 0x1ed   : > { %2110 = vmatmul.mubr.msk.f32.vlgmr.msra.gmra.mxu0 %vm963_vm6, %v941_v23  ;;  %1058 = vmatprep.mubr.f32.mxu1 %v943_v18 }
 0x1ee   : > { %1171 = vmatprep.mubr.f32.mxu0 %v2237_v6 }
 0x1f0   : > { %1059 = vmatmul.mubr.f32.gmra.mxu1 %v942_v13 }
 0x1f1   : > { %2111 = vmatmul.mubr.msk.f32.gmra.mxu0 %vm963_vm6, %v944_v43  ;;  %1064 = vmatprep.mubr.f32.mxu1 %v946_v8 }
 0x1f2   : > { %1177 = vmatprep.mubr.f32.mxu0 %v2237_v6  ;;  %v1225_v12 = vpop.permute.xlu0 %1224 }
 0x1f4   : > { %1065 = vmatmul.mubr.f32.gmra.mxu1 %v945_v4  ;;  %v1230_v40 = vpop.permute.xlu1 %1229 }
 0x1f5   : > { %2112 = vmatmul.mubr.msk.f32.gmra.mxu0 %vm963_vm6, %v947_v5  ;;  %1070 = vmatprep.mubr.f32.mxu1 %v949_v34 }
 0x1f6   : > { %1183 = vmatprep.mubr.f32.mxu0 %v2237_v6  ;;  %v3248_v19 = vpop.permute.xlu0 %1234 }
 0x1f8   : > { %1071 = vmatmul.mubr.f32.gmra.mxu1 %v948_v57  ;;  %v3254_v60 = vpop.permute.xlu1 %1239 }
 0x1f9   : > { %2113 = vmatmul.mubr.msk.f32.gmra.mxu0 %vm963_vm6, %v950_v30  ;;  %1076 = vmatprep.mubr.f32.mxu1 %v952_v59 }
 0x1fa   : > { %1189 = vmatprep.mubr.f32.mxu0 %v2237_v6  ;;  %v3250_v39 = vpop.permute.xlu0 %1244 }
 0x1fc   : > { %1077 = vmatmul.mubr.f32.gmra.mxu1 %v951_v16  ;;  %v3256_v58 = vpop.permute.xlu1 %1249 }
 0x1fd   : > { %2114 = vmatmul.mubr.msk.f32.gmra.mxu0 %vm963_vm6, %v953_v24  ;;  %1082 = vmatprep.mubr.f32.mxu1 %v955_v63 }
 0x1fe   : > { %1195 = vmatprep.mubr.f32.mxu0 %v2237_v6  ;;  %v3252_v50 = vpop.permute.xlu0 %1254 }
 0x200   : > { %1083 = vmatmul.mubr.f32.gmra.mxu1 %v954_v11  ;;  %v3260_v31 = vpop.permute.xlu1 %1259 }
 0x201   : > { %2115 = vmatmul.mubr.msk.f32.gmra.mxu0 %vm963_vm6, %v956_v54  ;;  %1088 = vmatprep.mubr.f32.mxu1 %v958_v7 }
 0x202   : > { %1201 = vmatprep.mubr.f32.mxu0 %v2237_v6  ;;  %v1289_v55 = vpop.permute.xlu0 %1288 }
 0x204   : > { %1089 = vmatmul.mubr.f32.gmra.mxu1 %v957_v15  ;;  %v1294_v52 = vpop.permute.xlu1 %1293 }
 0x205   : > { %2116 = vmatmul.mubr.msk.f32.gmra.mxu0 %vm963_vm6, %v959_v0  ;;  %1094 = vmatprep.mubr.f32.mxu1 %v961_v14 }
 0x206   : > { %1207 = vmatprep.mubr.f32.mxu0 %v2237_v6  ;;  %v3258_v6 = vpop.permute.xlu0 %1298 }
 0x208   : > { %1095 = vmatmul.mubr.f32.gmra.mxu1 %v960_v41  ;;  %v3266_v56 = vpop.permute.xlu1 %1303 }
 0x209   : > { %2117 = vmatmul.mubr.msk.f32.gmra.mxu0 %vm963_vm6, %v962_v1 }
 0x20a   : > { %v3262_v10 = vpop.permute.xlu0 %1308 }
 0x20c   : > { %v3270_v29 = vpop.permute.xlu1 %1313 }
 0x20e   : > { %v3264_v37 = vpop.permute.xlu0 %1318 }
 0x210   : > { %v3274_v53 = vpop.permute.xlu1 %1323 }
 0x212   : > { %v3268_v44 = vpop.permute.xlu0 %1384 }
 0x214   : > { %v3286_v43 = vpop.permute.xlu1 %1389 }
 0x216   : > { %v3272_v9 = vpop.permute.xlu0 %1394 }
 0x218   : > { %v3298_v34 = vpop.permute.xlu1 %1399 }
 0x21a   : > { %v3276_v38 = vpop.permute.xlu0 %1404 }
 0x21c   : > { %v3311_v0 = vpop.permute.xlu1 %1409 }
 0x21e   : > { %v3288_v8 = vpop.permute.xlu0 %1414 }
 0x222   : > { %v3300_v57 = vpop.permute.xlu0 %1496 }
 0x226   : > { %v3313_v14 = vpop.permute.xlu0 %1506 }
 0x2ac   : > { %v1054_v22 = vpop.f32.mrf.mxu1 }
 0x2ad   : > { %v1167_v35 = vpop.f32.mrf.mxu0 }
 0x2ae   : > { %v1168_v17 = vadd.f32 %v1167_v35, %v1054_v22  ;;  %v1056_v27 = vpop.f32.mrf.mxu1  ;;  %v3326_v22 = vpop.permute.xlu1 %1419 }
 0x2af   : > { %v1169_v46 = vpop.f32.mrf.mxu0  ;;  %3864 = vst [vmem:[#allocation8_spill] sm:$0xff] %v3326_v22  ;;  %v3328_v35 = vpop.permute.xlu0 %1516 }
 0x2b0   : > { %v1262_v2 = vmul.f32 %v1225_v12, %v1168_v17  ;;  %v1060_v36 = vpop.f32.mrf.mxu1  ;;  %v1170_v45 = vadd.f32 %v1169_v46, %v1056_v27 }
 0x2b1   : > { %v1173_v20 = vpop.f32.mrf.mxu0 }
 0x2b2   : > { %v1326_v25 = vadd.f32 %v1289_v55, %v1262_v2  ;;  %v1174_v61 = vadd.f32 %v1173_v20, %v1060_v36  ;;  %v1263_v32 = vmul.f32 %v1225_v12, %v1170_v45  ;;  %v1062_v18 = vpop.f32.mrf.mxu1  ;;  %v3339_v20 = vpop.permute.xlu1 %1501 }
 0x2b3   : > { %v1175_v21 = vpop.f32.mrf.mxu0 }
 0x2b4   : > { %v1342_v48 = vmax.f32 %v1326_v25, 0.0  ;;  %v1264_v47 = vmul.f32 %v1230_v40, %v1174_v61  ;;  %v1176_v13 = vadd.f32 %v1175_v21, %v1062_v18  ;;  %v1327_v4 = vadd.f32 %v1289_v55, %v1263_v32  ;;  %v1066_v16 = vpop.f32.mrf.mxu1  ;;  %v3341_v25 = vpop.permute.xlu0 %1526 }
 0x2b5   : > { %v1179_v24 = vpop.f32.mrf.mxu0 }
 0x2b6   : > { %v3279_v28 = vmul.f32 %v1342_v48, %v2480_v62  ;;  %v1328_v26 = vadd.f32 %v1294_v52, %v1264_v47  ;;  %v1265_v5 = vmul.f32 %v1230_v40, %v1176_v13  ;;  %v1343_v30 = vmax.f32 %v1327_v4, 0.0  ;;  %v1068_v7 = vpop.f32.mrf.mxu1 }
 0x2b7   : > { %v1180_v11 = vadd.f32 %v1179_v24, %v1066_v16  ;;  %v1181_v15 = vpop.f32.mrf.mxu0 }
 0x2b8   : > { %v1344_v33 = vmax.f32 %v1328_v26, 0.0  ;;  %1438 = vrot.lane.b32.xlu0 %v3279_v28, %s2239_s12  ;;  %v1329_v59 = vadd.f32 %v1294_v52, %v1265_v5  ;;  %v3307_v63 = vmul.f32 %v1343_v30, %v2482_v3  ;;  %v1182_v12 = vadd.f32 %v1181_v15, %v1068_v7  ;;  %v1072_v40 = vpop.f32.mrf.mxu1  ;;  %v3355_v47 = vpop.permute.xlu0 %1624 }
 0x2b9   : > { %v1266_v41 = vmul.f32 %v3248_v19, %v1180_v11  ;;  %v1185_v55 = vpop.f32.mrf.mxu0  ;;  %v1422_v22 = vmul.f32 %v3268_v44, %v3279_v28 }
 0x2ba   : > { %v3284_v23 = vmul.f32 %v1344_v33, %v2480_v62  ;;  %v1345_v54 = vmax.f32 %v1329_v59, 0.0  ;;  %v1267_v17 = vmul.f32 %v3248_v19, %v1182_v12  ;;  %v1186_v27 = vadd.f32 %v1185_v55, %v1072_v40  ;;  %v1074_v33 = vpop.f32.mrf.mxu1 }
 0x2bb   : > { %v1330_v52 = vadd.f32 %v3258_v6, %v1266_v41  ;;  %v1187_v21 = vpop.f32.mrf.mxu0 }
 0x2bc   : > { %1566 = vrot.lane.b32.xlu0 %v3279_v28, %s2240_s19  ;;  %1440 = vrot.lane.b32.xlu1 %v3284_v23, %s2239_s12  ;;  %v3319_v1 = vmul.f32 %v1345_v54, %v2482_v3  ;;  %v1331_v2 = vadd.f32 %v3258_v6, %v1267_v17  ;;  %v1268_v36 = vmul.f32 %v3254_v60, %v1186_v27  ;;  %v3353_v6 = vpop.permute.xlu1 %1511  ;;  %v3373_v4 = vpop.permute.xlu0 %1634 }
 0x2bd   : > { %v1346_v46 = vmax.f32 %v1330_v52, 0.0  ;;  %v1188_v18 = vadd.f32 %v1187_v21, %v1074_v33  ;;  %v1078_v30 = vpop.f32.mrf.mxu1  ;;  %v1191_v59 = vpop.f32.mrf.mxu0 }
 0x2be   : > { %v1347_v61 = vmax.f32 %v1331_v2, 0.0  ;;  %v1332_v48 = vadd.f32 %v3266_v56, %v1268_v36  ;;  %v1192_v16 = vadd.f32 %v1191_v59, %v1078_v30 }
 0x2bf   : > { %v3346_v19 = vmul.f32 %v1346_v46, %v2480_v62  ;;  %v1269_v5 = vmul.f32 %v3254_v60, %v1188_v18  ;;  %v1080_v11 = vpop.f32.mrf.mxu1  ;;  %v1193_v54 = vpop.f32.mrf.mxu0 }
 0x2c0   : > { %1694 = vrot.lane.b32.xlu0 %v3279_v28, %s2241_s14  ;;  %1568 = vrot.lane.b32.xlu1 %v3284_v23, %s2240_s19  ;;  %v3358_v45 = vmul.f32 %v1347_v61, %v2482_v3  ;;  %v1348_v26 = vmax.f32 %v1332_v48, 0.0  ;;  %v3371_v13 = vpop.permute.xlu1 %1521  ;;  %v3385_v15 = vpop.permute.xlu0 %1644  ;;  %v1270_v60 = vmul.f32 %v3250_v39, %v1192_v16  ;;  %v1194_v12 = vadd.f32 %v1193_v54, %v1080_v11 }
 0x2c1   : > { %v1333_v24 = vadd.f32 %v3266_v56, %v1269_v5  ;;  %v1084_v27 = vpop.f32.mrf.mxu1  ;;  %v1197_v46 = vpop.f32.mrf.mxu0 }
 0x2c2   : > { %v3365_v32 = vmul.f32 %v1348_v26, %v2480_v62  ;;  %v1334_v56 = vadd.f32 %v3262_v10, %v1270_v60  ;;  %v1271_v17 = vmul.f32 %v3250_v39, %v1194_v12  ;;  %v1198_v61 = vadd.f32 %v1197_v46, %v1084_v27 }
 0x2c3   : > { %v1349_v41 = vmax.f32 %v1333_v24, 0.0  ;;  %v1086_v59 = vpop.f32.mrf.mxu1  ;;  %v1199_v16 = vpop.f32.mrf.mxu0 }
 0x2c4   : > { %1822 = vrot.lane.b32.xlu0 %v3279_v28, %s3863_s29  ;;  %1696 = vrot.lane.b32.xlu1 %v3284_v23, %s2241_s14  ;;  %v3383_v7 = vpop.permute.xlu1 %1531  ;;  %v3397_v55 = vpop.permute.xlu0 %1654  ;;  %v1350_v2 = vmax.f32 %v1334_v56, 0.0  ;;  %v1335_v36 = vadd.f32 %v3262_v10, %v1271_v17  ;;  %v1272_v21 = vmul.f32 %v3256_v58, %v1198_v61  ;;  %v1200_v11 = vadd.f32 %v1199_v16, %v1086_v59 }
 0x2c5   : > { %3865 = vst [vmem:[#allocation9_spill] sm:$0xff] %v3383_v7  ;;  %3866 = vst [vmem:[#allocation10_spill] sm:$0xff] %v3397_v55  ;;  %v3400_v52 = vmul.f32 %v1349_v41, %v2482_v3  ;;  %v1090_v56 = vpop.f32.mrf.mxu1  ;;  %v1203_v17 = vpop.f32.mrf.mxu0  ;;  %v1423_v7 = vmul.f32 %v3268_v44, %v3307_v63 }
 0x2c6   : > { %v3417_v39 = vmul.f32 %v1350_v2, %v2480_v62  ;;  %v1351_v33 = vmax.f32 %v1335_v36, 0.0  ;;  %v1336_v30 = vadd.f32 %v3270_v29, %v1272_v21  ;;  %v1273_v12 = vmul.f32 %v3256_v58, %v1200_v11 }
 0x2c7   : > { %v1204_v27 = vadd.f32 %v1203_v17, %v1090_v56  ;;  %v1092_v61 = vpop.f32.mrf.mxu1 }
 0x2c8   : > { %1454 = vrot.lane.b32.xlu0 %v3307_v63, %s2239_s12  ;;  %1824 = vrot.lane.b32.xlu1 %v3284_v23, %s3863_s29  ;;  %v3395_v40 = vpop.permute.xlu1 %1629  ;;  %v3412_v26 = vpop.permute.xlu0 %1752  ;;  %v3429_v5 = vmul.f32 %v1351_v33, %v2482_v3  ;;  %v1352_v24 = vmax.f32 %v1336_v30, 0.0  ;;  %v1337_v36 = vadd.f32 %v3270_v29, %v1273_v12 }
 0x2c9   : > { %v1205_v33 = vpop.f32.mrf.mxu0  ;;  %v1274_v58 = vmul.f32 %v3252_v50, %v1204_v27  ;;  %v1096_v12 = vpop.f32.mrf.mxu1 }
 0x2ca   : > { %v3445_v41 = vmul.f32 %v1352_v24, %v2480_v62  ;;  %v1353_v21 = vmax.f32 %v1337_v36, 0.0  ;;  %v1206_v30 = vadd.f32 %v1205_v33, %v1092_v61 }
 0x2cb   : > { %v1338_v16 = vadd.f32 %v3264_v37, %v1274_v58  ;;  %v1209_v56 = vpop.f32.mrf.mxu0 }
 0x2cc   : > { %1582 = vrot.lane.b32.xlu0 %v3307_v63, %s2240_s19  ;;  %1456 = vrot.lane.b32.xlu1 %v3319_v1, %s2239_s12  ;;  %v3410_v48 = vpop.permute.xlu1 %1639  ;;  %v3426_v18 = vpop.permute.xlu0 %1762  ;;  %v3472_v24 = vmul.f32 %v1353_v21, %v2482_v3  ;;  %v1275_v11 = vmul.f32 %v3252_v50, %v1206_v30  ;;  %v1210_v61 = vadd.f32 %v1209_v56, %v1096_v12 }
 0x2cd   : > { %v1354_v17 = vmax.f32 %v1338_v16, 0.0  ;;  %v1098_v12 = vpop.f32.mrf.mxu1  ;;  %v1211_v56 = vpop.f32.mrf.mxu0 }
 0x2ce   : > { %v1339_v36 = vadd.f32 %v3264_v37, %v1275_v11  ;;  %v1276_v21 = vmul.f32 %v3260_v31, %v1210_v61  ;;  %v1212_v61 = vadd.f32 %v1211_v56, %v1098_v12 }
 0x2cf   : > { %v3489_v50 = vmul.f32 %v1354_v17, %v2480_v62 }
 0x2d0   : > { %1710 = vrot.lane.b32.xlu0 %v3307_v63, %s2241_s14  ;;  %1584 = vrot.lane.b32.xlu1 %v3319_v1, %s2240_s19  ;;  %v3424_v10 = vpop.permute.xlu1 %1649  ;;  %v3440_v60 = vpop.permute.xlu0 %1885  ;;  %v1355_v58 = vmax.f32 %v1339_v36, 0.0  ;;  %v1340_v11 = vadd.f32 %v3274_v53, %v1276_v21  ;;  %v1277_v21 = vmul.f32 %v3260_v31, %v1212_v61 }
 0x2d2   : > { %v3501_v16 = vmul.f32 %v1355_v58, %v2482_v3  ;;  %v1356_v36 = vmax.f32 %v1340_v11, 0.0  ;;  %v1341_v12 = vadd.f32 %v3274_v53, %v1277_v21 }
 0x2d4   : > { %1838 = vrot.lane.b32.xlu0 %v3307_v63, %s3863_s29  ;;  %1712 = vrot.lane.b32.xlu1 %v3319_v1, %s2241_s14  ;;  %v3438_v54 = vpop.permute.xlu1 %1659  ;;  %v3454_v2 = vpop.permute.xlu0 %1890  ;;  %3869 = vst [vmem:[#allocation13_spill] sm:$0xff] %v3501_v16  ;;  %v3517_v58 = vmul.f32 %v1356_v36, %v2480_v62  ;;  %v1357_v56 = vmax.f32 %v1341_v12, 0.0 }
 0x2d5   : > { %3867 = vst [vmem:[#allocation11_spill] sm:$0xff] %v3438_v54 }
 0x2d6   : > { %3872 = vst [vmem:[#allocation16_spill] sm:$0xff] %v3517_v58  ;;  %v3540_v61 = vmul.f32 %v1357_v56, %v2482_v3 }
 0x2d8   : > { %1442 = vrot.lane.b32.xlu0 %v3346_v19, %s2239_s12  ;;  %1840 = vrot.lane.b32.xlu1 %v3319_v1, %s3863_s29  ;;  %v3452_v46 = vpop.permute.xlu1 %1757  ;;  %v3468_v29 = vpop.permute.xlu0 %1895 }
 0x2dc   : > { %1570 = vrot.lane.b32.xlu0 %v3346_v19, %s2240_s19  ;;  %1842 = vrot.lane.b32.xlu1 %v3358_v45, %s3863_s29  ;;  %v3464_v59 = vpop.permute.xlu1 %1880  ;;  %v3482_v33 = vpop.permute.xlu0 %1900 }
 0x2e0   : > { %1698 = vrot.lane.b32.xlu0 %v3346_v19, %s2241_s14  ;;  %1444 = vrot.lane.b32.xlu1 %v3365_v32, %s2239_s12  ;;  %v3479_v27 = vpop.permute.xlu1 %1767  ;;  %v3498_v37 = vpop.permute.xlu0 %1782 }
 0x2e1   : > { %3868 = vst [vmem:[#allocation12_spill] sm:$0xff] %v3498_v37 }
 0x2e4   : > { %1826 = vrot.lane.b32.xlu0 %v3346_v19, %s3863_s29  ;;  %1572 = vrot.lane.b32.xlu1 %v3365_v32, %s2240_s19  ;;  %v3494_v30 = vpop.permute.xlu1 %1772  ;;  %v3510_v49 = vpop.permute.xlu0 %1910 }
 0x2e5   : > { %3871 = vst [vmem:[#allocation15_spill] sm:$0xff] %v3510_v49 }
 0x2e8   : > { %1458 = vrot.lane.b32.xlu0 %v3358_v45, %s2239_s12  ;;  %1700 = vrot.lane.b32.xlu1 %v3365_v32, %s2241_s14  ;;  %v3508_v17 = vpop.permute.xlu1 %1777  ;;  %v3526_v11 = vpop.permute.xlu0 %1915 }
 0x2e9   : > { %3870 = vst [vmem:[#allocation14_spill] sm:$0xff] %v3508_v17  ;;  %3874 = vst [vmem:[#allocation18_spill] sm:$0xff] %v3526_v11 }
 0x2ec   : > { %1586 = vrot.lane.b32.xlu0 %v3358_v45, %s2240_s19  ;;  %1828 = vrot.lane.b32.xlu1 %v3365_v32, %s3863_s29  ;;  %v3522_v51 = vpop.permute.xlu1 %1905 }
 0x2ed   : > { %3873 = vst [vmem:[#allocation17_spill] sm:$0xff] %v3522_v51 }
 0x2f0   : > { %1714 = vrot.lane.b32.xlu0 %v3358_v45, %s2241_s14  ;;  %1460 = vrot.lane.b32.xlu1 %v3400_v52, %s2239_s12  ;;  %v3533_v31 = vpop.permute.xlu1 %1787 }
 0x2f1   : > { %3875 = vst [vmem:[#allocation19_spill] sm:$0xff] %v3533_v31 }
 0x2f4   : > { %1844 = vrot.lane.b32.xlu0 %v3400_v52, %s3863_s29  ;;  %1588 = vrot.lane.b32.xlu1 %v3400_v52, %s2240_s19 }
 0x2f8   : > { %1446 = vrot.lane.b32.xlu0 %v3417_v39, %s2239_s12  ;;  %1716 = vrot.lane.b32.xlu1 %v3400_v52, %s2241_s14 }
 0x2fc   : > { %1574 = vrot.lane.b32.xlu0 %v3417_v39, %s2240_s19  ;;  %1718 = vrot.lane.b32.xlu1 %v3429_v5, %s2241_s14 }
 0x300   : > { %1702 = vrot.lane.b32.xlu0 %v3417_v39, %s2241_s14  ;;  %1846 = vrot.lane.b32.xlu1 %v3429_v5, %s3863_s29 }
 0x304   : > { %1830 = vrot.lane.b32.xlu0 %v3417_v39, %s3863_s29  ;;  %1448 = vrot.lane.b32.xlu1 %v3445_v41, %s2239_s12 }
 0x308   : > { %1462 = vrot.lane.b32.xlu0 %v3429_v5, %s2239_s12  ;;  %1576 = vrot.lane.b32.xlu1 %v3445_v41, %s2240_s19 }
 0x30c   : > { %1590 = vrot.lane.b32.xlu0 %v3429_v5, %s2240_s19  ;;  %1704 = vrot.lane.b32.xlu1 %v3445_v41, %s2241_s14 }
 0x310   : > { %1832 = vrot.lane.b32.xlu0 %v3445_v41, %s3863_s29  ;;  %1464 = vrot.lane.b32.xlu1 %v3472_v24, %s2239_s12 }
 0x314   : > { %1720 = vrot.lane.b32.xlu0 %v3472_v24, %s2241_s14  ;;  %1592 = vrot.lane.b32.xlu1 %v3472_v24, %s2240_s19 }
 0x318   : > { %1450 = vrot.lane.b32.xlu0 %v3489_v50, %s2239_s12  ;;  %1848 = vrot.lane.b32.xlu1 %v3472_v24, %s3863_s29 }
 0x31c   : > { %1578 = vrot.lane.b32.xlu0 %v3489_v50, %s2240_s19  ;;  %1722 = vrot.lane.b32.xlu1 %v3501_v16, %s2241_s14 }
 0x320   : > { %1706 = vrot.lane.b32.xlu0 %v3489_v50, %s2241_s14  ;;  %1850 = vrot.lane.b32.xlu1 %v3501_v16, %s3863_s29 }
 0x324   : > { %1466 = vrot.lane.b32.xlu0 %v3501_v16, %s2239_s12  ;;  %1452 = vrot.lane.b32.xlu1 %v3517_v58, %s2239_s12 }
 0x328   : > { %1594 = vrot.lane.b32.xlu0 %v3501_v16, %s2240_s19  ;;  %1580 = vrot.lane.b32.xlu1 %v3517_v58, %s2240_s19 }
 0x32a   : > { %v1439_v62 = vpop.permute.xlu0 %1438 }
 0x32c   : > { %1834 = vrot.lane.b32.xlu0 %v3489_v50, %s3863_s29  ;;  %1708 = vrot.lane.b32.xlu1 %v3517_v58, %s2241_s14 }
 0x32e   : > { %v1567_v36 = vpop.permute.xlu0 %1566  ;;  %v1441_v53 = vpop.permute.xlu1 %1440 }
 0x330   : > { %1836 = vrot.lane.b32.xlu0 %v3517_v58, %s3863_s29  ;;  %1468 = vrot.lane.b32.xlu1 %v3540_v61, %s2239_s12  ;;  %s1976_s12 = sld [smem:[#allocation2]] }
 0x332   : > { %v1695_v21 = vpop.permute.xlu0 %1694  ;;  %v1569_v11 = vpop.permute.xlu1 %1568 }
 0x334   : > { %1596 = vrot.lane.b32.xlu1 %v3540_v61, %s2240_s19  ;;  %s2098_s19 = sshll.u32 %s2361_s13, 1 }
 0x335   : > { %s402_s30 = scalar_lea.vmem [#allocation4], %s2098_s19 }
 0x336   : > { %v1823_v12 = vpop.permute.xlu0 %1822  ;;  %v1697_v31 = vpop.permute.xlu1 %1696  ;;  %s2018_s11 = sshll.u32 %s402_s30, 4  ;;  %s2019_s11 = int_to_ptr.vmem [resolvable:$true] %s2018_s11 }
 0x337   : > { %s2175_s28 = scalar_lea.vmem %s2019_s11, 32 }
 0x338   : > { %1724 = vrot.lane.b32.xlu1 %v3540_v61, %s2241_s14  ;;  %s2124_s14 = sshll.u32 %s2324_s9, 5  ;;  %p2176_p0 = scmp.ne.s32.totalorder %s2019_s11, %s2175_s28 }
 0x339   : > { %s2016_s26 = scalar_lea.hbm %s3842_s10, %s2124_s14 }
 0x33a   : > { %v1455_v54 = vpop.permute.xlu0 %1454  ;;  %v1825_v49 = vpop.permute.xlu1 %1824  ;;  %p2177_p1 = pnand %p2176_p0, %p2342_p6 }
 0x33b   : > { %v1470_v3 = vsel %vm775_vm3, %v1439_v62, %v1455_v54  ;;  %v1478_v56 = vsel %vm775_vm3, %v1455_v54, %v1439_v62 }
 0x33c   : > { %v1534_v58 = vmul.f32 %v3300_v57, %v1478_v56  ;;  %v1535_v37 = vmul.f32 %v3300_v57, %v1470_v3  ;;  %1852 = vrot.lane.b32.xlu1 %v3540_v61, %s3863_s29  ;;  %p2178_p2 = pneg %p2177_p1  ;;  %s2244_s29 = smov [#allocation4]  }
 0x33d   : > { %s2179_s9 = sshll.u32 %s2244_s29, 4  ;;  %s2180_s9 = int_to_ptr.vmem [resolvable:$false] %s2179_s9 }
 0x33e   : > { %v1550_v51 = vadd.f32 %v1534_v58, %v1422_v22  ;;  %v1551_v17 = vadd.f32 %v1535_v37, %v1423_v7  ;;  %v1583_v55 = vpop.permute.xlu0 %1582  ;;  %v1457_v63 = vpop.permute.xlu1 %1456  ;;  %v1424_v22 = vmul.f32 %v3286_v43, %v3284_v23  ;;  %v1425_v7 = vmul.f32 %v3286_v43, %v3319_v1  ;;  %p2182_p3 = scmp.lt.s32.totalorder %s2019_s11, %s2180_s9 }
 0x33f   : > { %v1598_v54 = vsel %vm824_vm2, %v1567_v36, %v1583_v55  ;;  %v1606_v62 = vsel %vm824_vm2, %v1583_v55, %v1567_v36  ;;  %v1471_v28 = vsel %vm775_vm3, %v1441_v53, %v1457_v63  ;;  %v1479_v57 = vsel %vm775_vm3, %v1457_v63, %v1441_v53 }
 0x340   : > { %v1662_v16 = vmul.f32 %v3355_v47, %v1606_v62  ;;  %v1663_v44 = vmul.f32 %v3355_v47, %v1598_v54  ;;  %v1536_v37 = vmul.f32 %v3339_v20, %v1479_v57  ;;  %v1537_v55 = vmul.f32 %v3339_v20, %v1471_v28 }
 0x342   : > { %v1678_v58 = vadd.f32 %v1662_v16, %v1550_v51  ;;  %v1679_v36 = vadd.f32 %v1663_v44, %v1551_v17  ;;  %v1711_v3 = vpop.permute.xlu0 %1710  ;;  %v1552_v47 = vadd.f32 %v1536_v37, %v1424_v22  ;;  %v1553_v56 = vadd.f32 %v1537_v55, %v1425_v7  ;;  %v1585_v62 = vpop.permute.xlu1 %1584 }
 0x343   : > { %v1726_v54 = vsel %vm873_vm4, %v1695_v21, %v1711_v3  ;;  %v1734_v53 = vsel %vm873_vm4, %v1711_v3, %v1695_v21  ;;  %v1599_v1 = vsel %vm824_vm2, %v1569_v11, %v1585_v62  ;;  %v1607_v51 = vsel %vm824_vm2, %v1585_v62, %v1569_v11 }
 0x344   : > { %v1790_v23 = vmul.f32 %v3412_v26, %v1726_v54  ;;  %v1791_v43 = vmul.f32 %v3412_v26, %v1734_v53  ;;  %v1664_v20 = vmul.f32 %v3395_v40, %v1607_v51  ;;  %v1665_v16 = vmul.f32 %v3395_v40, %v1599_v1 }
 0x346   : > { %v1806_v17 = vadd.f32 %v1790_v23, %v1678_v58  ;;  %v1807_v63 = vadd.f32 %v1791_v43, %v1679_v36  ;;  %v1839_v44 = vpop.permute.xlu0 %1838  ;;  %v1680_v28 = vadd.f32 %v1664_v20, %v1552_v47  ;;  %v1681_v21 = vadd.f32 %v1665_v16, %v1553_v56  ;;  %v1713_v22 = vpop.permute.xlu1 %1712 }
 0x347   : > { %v1854_v57 = vsel %vm922_vm5, %v1823_v12, %v1839_v44  ;;  %v1862_v26 = vsel %vm922_vm5, %v1839_v44, %v1823_v12  ;;  %v1727_v37 = vsel %vm873_vm4, %v1697_v31, %v1713_v22  ;;  %v1735_v40 = vsel %vm873_vm4, %v1713_v22, %v1697_v31 }
 0x348   : > { %v1918_v7 = vmul.f32 %v3464_v59, %v1854_v57  ;;  %v1919_v11 = vmul.f32 %v3464_v59, %v1862_v26  ;;  %v1792_v55 = vmul.f32 %v3452_v46, %v1727_v37  ;;  %v1793_v58 = vmul.f32 %v3452_v46, %v1735_v40 }
 0x349   : > { %v1426_v22 = vmul.f32 %v3272_v9, %v3346_v19 }
 0x34a   : > { %v1934_v36 = vadd.f32 %v1918_v7, %v1806_v17  ;;  %v1935_v3 = vadd.f32 %v1919_v11, %v1807_v63  ;;  %v1443_v47 = vpop.permute.xlu0 %1442  ;;  %v1808_v56 = vadd.f32 %v1792_v55, %v1680_v28  ;;  %v1809_v12 = vadd.f32 %v1793_v58, %v1681_v21  ;;  %v1841_v54 = vpop.permute.xlu1 %1840 }
 0x34b   : > { %v1855_v53 = vsel %vm922_vm5, %v1825_v49, %v1841_v54  ;;  %v1863_v59 = vsel %vm922_vm5, %v1841_v54, %v1825_v49  ;;  %v1427_v7 = vmul.f32 %v3272_v9, %v3358_v45 }
 0x34c   : > { %v1920_v62 = vmul.f32 %v3440_v60, %v1855_v53  ;;  %v1921_v31 = vmul.f32 %v3440_v60, %v1863_v59 }
 0x34e   : > { %v1571_v23 = vpop.permute.xlu0 %1570  ;;  %v1936_v43 = vadd.f32 %v1920_v62, %v1808_v56  ;;  %v1937_v1 = vadd.f32 %v1921_v31, %v1809_v12  ;;  %v1843_v46 = vpop.permute.xlu1 %1842 }
 0x350   : > { %v1950_v51 = vadd.f32 %v1936_v43, %v1934_v36  ;;  %v1963_v20 = vadd.f32 %v1937_v1, %v1935_v3  ;;  %v1429_v43 = vmul.f32 %v3298_v34, %v3400_v52 }
 0x352   : > { %v1699_v16 = vpop.permute.xlu0 %1698  ;;  %v1445_v17 = vpop.permute.xlu1 %1444 }
 0x356   : > { %v1827_v63 = vpop.permute.xlu0 %1826  ;;  %v1573_v49 = vpop.permute.xlu1 %1572 }
 0x357   : > { %v1856_v44 = vsel %vm922_vm5, %v1827_v63, %v1843_v46  ;;  %v1864_v28 = vsel %vm922_vm5, %v1843_v46, %v1827_v63 }
 0x35a   : > { %v1459_v21 = vpop.permute.xlu0 %1458  ;;  %v1701_v26 = vpop.permute.xlu1 %1700 }
 0x35b   : > { %v1472_v60 = vsel %vm775_vm3, %v1443_v47, %v1459_v21  ;;  %v1480_v57 = vsel %vm775_vm3, %v1459_v21, %v1443_v47 }
 0x35c   : > { %v1538_v11 = vmul.f32 %v3313_v14, %v1480_v57  ;;  %v1539_v37 = vmul.f32 %v3313_v14, %v1472_v60 }
 0x35e   : > { %v1554_v40 = vadd.f32 %v1538_v11, %v1426_v22  ;;  %v1555_v55 = vadd.f32 %v1539_v37, %v1427_v7  ;;  %v1587_v58 = vpop.permute.xlu0 %1586  ;;  %v1829_v47 = vpop.permute.xlu1 %1828 }
 0x35f   : > { %v1600_v36 = vsel %vm824_vm2, %v1571_v23, %v1587_v58  ;;  %v1608_v3 = vsel %vm824_vm2, %v1587_v58, %v1571_v23  ;;  %v1428_v23 = vmul.f32 %v3298_v34, %v3365_v32 }
 0x360   : > { %v1666_v56 = vmul.f32 %v3373_v4, %v1608_v3  ;;  %v1667_v19 = vmul.f32 %v3373_v4, %v1600_v36 }
 0x362   : > { %v1682_v12 = vadd.f32 %v1666_v56, %v1554_v40  ;;  %v1683_v9 = vadd.f32 %v1667_v19, %v1555_v55  ;;  %v1715_v45 = vpop.permute.xlu0 %1714  ;;  %v1461_v53 = vpop.permute.xlu1 %1460 }
 0x363   : > { %v1728_v14 = vsel %vm873_vm4, %v1699_v16, %v1715_v45  ;;  %v1736_v54 = vsel %vm873_vm4, %v1715_v45, %v1699_v16  ;;  %v1473_v31 = vsel %vm775_vm3, %v1445_v17, %v1461_v53  ;;  %v1481_v4 = vsel %vm775_vm3, %v1461_v53, %v1445_v17 }
 0x364   : > { %v1794_v59 = vmul.f32 %v3426_v18, %v1728_v14  ;;  %v1795_v62 = vmul.f32 %v3426_v18, %v1736_v54  ;;  %v1540_v1 = vmul.f32 %v3353_v6, %v1481_v4  ;;  %v1541_v46 = vmul.f32 %v3353_v6, %v1473_v31 }
 0x365   : > { %v1922_v16 = vmul.f32 %v3454_v2, %v1856_v44  ;;  %v1923_v18 = vmul.f32 %v3454_v2, %v1864_v28 }
 0x366   : > { %v1810_v63 = vadd.f32 %v1794_v59, %v1682_v12  ;;  %v1811_v21 = vadd.f32 %v1795_v62, %v1683_v9  ;;  %v1845_v60 = vpop.permute.xlu0 %1844  ;;  %v1556_v57 = vadd.f32 %v1540_v1, %v1428_v23  ;;  %v1557_v22 = vadd.f32 %v1541_v46, %v1429_v43  ;;  %v1589_v17 = vpop.permute.xlu1 %1588 }
 0x367   : > { %v1601_v32 = vsel %vm824_vm2, %v1573_v49, %v1589_v17  ;;  %v1609_v34 = vsel %vm824_vm2, %v1589_v17, %v1573_v49  ;;  %v1857_v37 = vsel %vm922_vm5, %v1829_v47, %v1845_v60  ;;  %v1865_v40 = vsel %vm922_vm5, %v1845_v60, %v1829_v47 }
 0x368   : > { %v1938_v7 = vadd.f32 %v1922_v16, %v1810_v63  ;;  %v1939_v11 = vadd.f32 %v1923_v18, %v1811_v21  ;;  %v1668_v44 = vmul.f32 %v3410_v48, %v1609_v34  ;;  %v1669_v2 = vmul.f32 %v3410_v48, %v1601_v32 }
 0x369   : > { %v1924_v56 = vmul.f32 %v3468_v29, %v1857_v37  ;;  %v1925_v19 = vmul.f32 %v3468_v29, %v1865_v40  ;;  %v1430_v43 = vmul.f32 %v3276_v38, %v3417_v39 }
 0x36a   : > { %v1951_v52 = vadd.f32 %v1950_v51, %v1938_v7  ;;  %v1964_v6 = vadd.f32 %v1963_v20, %v1939_v11  ;;  %v1447_v28 = vpop.permute.xlu0 %1446  ;;  %v1717_v55 = vpop.permute.xlu1 %1716  ;;  %v1684_v58 = vadd.f32 %v1668_v44, %v1556_v57  ;;  %v1685_v36 = vadd.f32 %v1669_v2, %v1557_v22 }
 0x36b   : > { %v1729_v3 = vsel %vm873_vm4, %v1701_v26, %v1717_v55  ;;  %v1737_v51 = vsel %vm873_vm4, %v1717_v55, %v1701_v26 }
 0x36c   : > { %v1796_v20 = vmul.f32 %v3479_v27, %v1729_v3  ;;  %v1797_v48 = vmul.f32 %v3479_v27, %v1737_v51 }
 0x36e   : > { %v1575_v49 = vpop.permute.xlu0 %1574  ;;  %v1812_v12 = vadd.f32 %v1796_v20, %v1684_v58  ;;  %v1813_v47 = vadd.f32 %v1797_v48, %v1685_v36  ;;  %v1719_v9 = vpop.permute.xlu1 %1718 }
 0x370   : > { %v1940_v45 = vadd.f32 %v1924_v56, %v1812_v12  ;;  %v1941_v14 = vadd.f32 %v1925_v19, %v1813_v47 }
 0x372   : > { %v1703_v54 = vpop.permute.xlu0 %1702  ;;  %v1952_v53 = vadd.f32 %v1951_v52, %v1940_v45  ;;  %v3664_v59 = vadd.f32 %v1964_v6, %v1941_v14  ;;  %v3666_v62 = vpop.permute.xlu1 %1846 }
 0x373   : > { %v1730_v46 = vsel %vm873_vm4, %v1703_v54, %v1719_v9 }
 0x374   : > { %v1798_v57 = vmul.f32 %v3494_v30, %v1730_v46 }
 0x376   : > { %v3668_v26 = vpop.permute.xlu0 %1830  ;;  %v1449_v31 = vpop.permute.xlu1 %1448 }
 0x377   : > { %v1858_v60 = vsel %vm922_vm5, %v3668_v26, %v3666_v62 }
 0x378   : > { %v1926_v7 = vmul.f32 %v3482_v33, %v1858_v60 }
 0x37a   : > { %v1463_v27 = vpop.permute.xlu0 %1462  ;;  %v1577_v23 = vpop.permute.xlu1 %1576 }
 0x37b   : > { %v1482_v4 = vsel %vm775_vm3, %v1463_v27, %v1447_v28  ;;  %v1474_v3 = vsel %vm775_vm3, %v1447_v28, %v1463_v27 }
 0x37c   : > { %v1542_v29 = vmul.f32 %v3328_v35, %v1482_v4  ;;  %v1543_v19 = vmul.f32 %v3328_v35, %v1474_v3  ;;  %v1433_v35 = vmul.f32 %v3311_v0, %v3472_v24 }
 0x37e   : > { %v1591_v1 = vpop.permute.xlu0 %1590  ;;  %v1705_v18 = vpop.permute.xlu1 %1704  ;;  %v1558_v63 = vadd.f32 %v1542_v29, %v1430_v43 }
 0x37f   : > { %v1610_v16 = vsel %vm824_vm2, %v1591_v1, %v1575_v49  ;;  %v1602_v56 = vsel %vm824_vm2, %v1575_v49, %v1591_v1  ;;  %v1432_v49 = vmul.f32 %v3311_v0, %v3445_v41 }
 0x380   : > { %v1670_v21 = vmul.f32 %v3385_v15, %v1610_v16 }
 0x382   : > { %v1686_v22 = vadd.f32 %v1670_v21, %v1558_v63  ;;  %v1833_v39 = vpop.permute.xlu0 %1832  ;;  %v1465_v17 = vpop.permute.xlu1 %1464  ;;  %v3876_v21 = vld [vmem:[#allocation13_spill] sm:$0xff] }
 0x383   : > { %v1475_v20 = vsel %vm775_vm3, %v1449_v31, %v1465_v17  ;;  %v1483_v48 = vsel %vm775_vm3, %v1465_v17, %v1449_v31  ;;  %v1671_v31 = vmul.f32 %v3385_v15, %v1602_v56  ;;  %v1435_v60 = vmul.f32 %v3288_v8, %v3876_v21  ;;  %v3877_v17 = vld [vmem:[#allocation10_spill] sm:$0xff] }
 0x384   : > { %v1814_v11 = vadd.f32 %v1798_v57, %v1686_v22  ;;  %v1544_v28 = vmul.f32 %v3371_v13, %v1483_v48  ;;  %v1545_v45 = vmul.f32 %v3371_v13, %v1475_v20  ;;  %v1866_v22 = vsel %vm922_vm5, %v3666_v62, %v3668_v26 }
 0x386   : > { %v1942_v32 = vadd.f32 %v1926_v7, %v1814_v11  ;;  %v1721_v34 = vpop.permute.xlu0 %1720  ;;  %v1593_v52 = vpop.permute.xlu1 %1592  ;;  %v1560_v41 = vadd.f32 %v1544_v28, %v1432_v49  ;;  %v1561_v0 = vadd.f32 %v1545_v45, %v1433_v35  ;;  %v3878_v11 = vld [vmem:[#allocation14_spill] sm:$0xff]  ;;  %v3881_v35 = vld [vmem:[#allocation16_spill] sm:$0xff] }
 0x387   : > { %v1603_v12 = vsel %vm824_vm2, %v1577_v23, %v1593_v52  ;;  %v1611_v47 = vsel %vm824_vm2, %v1593_v52, %v1577_v23  ;;  %v1731_v1 = vsel %vm873_vm4, %v1705_v18, %v1721_v34  ;;  %v1739_v46 = vsel %vm873_vm4, %v1721_v34, %v1705_v18 }
 0x388   : > { %v3686_v6 = vadd.f32 %v1952_v53, %v1942_v32  ;;  %v1431_v53 = vmul.f32 %v3276_v38, %v3429_v5  ;;  %v1672_v4 = vmul.f32 %v3424_v10, %v1611_v47  ;;  %v1673_v23 = vmul.f32 %v3424_v10, %v1603_v12  ;;  %v3879_v12 = vld [vmem:[#allocation17_spill] sm:$0xff] }
 0x389   : > { %v1738_v38 = vsel %vm873_vm4, %v1719_v9, %v1703_v54  ;;  %v1434_v5 = vmul.f32 %v3288_v8, %v3489_v50  ;;  %v1800_v32 = vmul.f32 %v3878_v11, %v1731_v1 }
 0x38a   : > { %v1451_v44 = vpop.permute.xlu0 %1450  ;;  %v1849_v2 = vpop.permute.xlu1 %1848  ;;  %v1559_v15 = vadd.f32 %v1543_v19, %v1431_v53  ;;  %v1688_v16 = vadd.f32 %v1672_v4, %v1560_v41  ;;  %v1689_v63 = vadd.f32 %v1673_v23, %v1561_v0  ;;  %v1799_v57 = vmul.f32 %v3494_v30, %v1738_v38  ;;  %v3883_v23 = vld [vmem:[#allocation9_spill] sm:$0xff] }
 0x38b   : > { %v1859_v34 = vsel %vm922_vm5, %v1833_v39, %v1849_v2  ;;  %v1867_v8 = vsel %vm922_vm5, %v1849_v2, %v1833_v39 }
 0x38c   : > { %v1687_v50 = vadd.f32 %v1671_v31, %v1559_v15  ;;  %v1816_v3 = vadd.f32 %v1800_v32, %v1688_v16  ;;  %v1928_v47 = vmul.f32 %v3879_v12, %v1859_v34 }
 0x38e   : > { %v1579_v37 = vpop.permute.xlu0 %1578  ;;  %v1723_v40 = vpop.permute.xlu1 %1722 }
 0x392   : > { %v1707_v55 = vpop.permute.xlu0 %1706  ;;  %v3688_v58 = vpop.permute.xlu1 %1850 }
 0x393   : > { %v1732_v52 = vsel %vm873_vm4, %v1707_v55, %v1723_v40  ;;  %v1740_v62 = vsel %vm873_vm4, %v1723_v40, %v1707_v55  ;;  %v1929_v40 = vmul.f32 %v3879_v12, %v1867_v8  ;;  %v3880_v55 = vld [vmem:[#allocation12_spill] sm:$0xff] }
 0x394   : > { %v1802_v28 = vmul.f32 %v3880_v55, %v1732_v52 }
 0x396   : > { %v1467_v36 = vpop.permute.xlu0 %1466  ;;  %v1453_v51 = vpop.permute.xlu1 %1452 }
 0x397   : > { %v1476_v13 = vsel %vm775_vm3, %v1451_v44, %v1467_v36  ;;  %v1484_v29 = vsel %vm775_vm3, %v1467_v36, %v1451_v44  ;;  %v1815_v36 = vadd.f32 %v1799_v57, %v1687_v50 }
 0x398   : > { %v1546_v9 = vmul.f32 %v3341_v25, %v1484_v29  ;;  %v1547_v54 = vmul.f32 %v3341_v25, %v1476_v13  ;;  %v1801_v25 = vmul.f32 %v3878_v11, %v1739_v46 }
 0x39a   : > { %v1581_v14 = vpop.permute.xlu1 %1580  ;;  %v1595_v27 = vpop.permute.xlu0 %1594  ;;  %v1562_v26 = vadd.f32 %v1546_v9, %v1434_v5  ;;  %v1563_v44 = vadd.f32 %v1547_v54, %v1435_v60  ;;  %v1817_v20 = vadd.f32 %v1801_v25, %v1689_v63  ;;  %v1944_v9 = vadd.f32 %v1928_v47, %v1816_v3 }
 0x39b   : > { %v1604_v24 = vsel %vm824_vm2, %v1579_v37, %v1595_v27  ;;  %v1612_v10 = vsel %vm824_vm2, %v1595_v27, %v1579_v37  ;;  %v1927_v37 = vmul.f32 %v3482_v33, %v1866_v22  ;;  %v1803_v33 = vmul.f32 %v3880_v55, %v1740_v62  ;;  %v3882_v27 = vld [vmem:[#allocation8_spill] sm:$0xff] }
 0x39c   : > { %v1674_v7 = vmul.f32 %v3877_v17, %v1612_v10  ;;  %v1675_v18 = vmul.f32 %v3877_v17, %v1604_v24  ;;  %v1436_v4 = vmul.f32 %v3882_v27, %v3881_v35  ;;  %v1437_v41 = vmul.f32 %v3882_v27, %v3540_v61  ;;  %v3885_v10 = vld [vmem:[#allocation11_spill] sm:$0xff] }
 0x39d   : > { %v1943_v38 = vadd.f32 %v1927_v37, %v1815_v36  ;;  %v1945_v54 = vadd.f32 %v1929_v40, %v1817_v20  ;;  %v3886_v61 = vld [vmem:[#allocation19_spill] sm:$0xff]  ;;  %v1954_v34 = vadd.f32 %v3686_v6, %v1944_v9  ;;  %v2243_v47 = vmov 1966171168  }
 0x39e   : > { %v1709_v43 = vpop.permute.xlu1 %1708  ;;  %v1835_v48 = vpop.permute.xlu0 %1834  ;;  %v1690_v56 = vadd.f32 %v1674_v7, %v1562_v26  ;;  %v1691_v19 = vadd.f32 %v1675_v18, %v1563_v44  ;;  %v3887_v26 = vld [vmem:[#allocation18_spill] sm:$0xff]  ;;  %v1984_v40 = vunpack.c.l.s4 %v2243_v47 }
 0x39f   : > { %v1860_v53 = vsel %vm922_vm5, %v1835_v48, %v3688_v58  ;;  %v1868_v31 = vsel %vm922_vm5, %v3688_v58, %v1835_v48  ;;  %v3884_v58 = vld [vmem:[#allocation15_spill] sm:$0xff]  ;;  %v1966_v22 = vadd.f32 %v3664_v59, %v1943_v38  ;;  %v3889_v38 = vlaneseq }
 0x3a0   : > { %v1818_v15 = vadd.f32 %v1802_v28, %v1690_v56  ;;  %v1819_v5 = vadd.f32 %v1803_v33, %v1691_v19  ;;  %v1930_v0 = vmul.f32 %v3884_v58, %v1860_v53  ;;  %v1931_v24 = vmul.f32 %v3884_v58, %v1868_v31 }
 0x3a1   : > { %v1967_v8 = vadd.f32 %v1966_v22, %v1945_v54  ;;  %v1985_v53 = vunpack.c.0.s8 %v1984_v40  ;;  %v1977_v31 = vstv %s1976_s12  ;;  %vm2000_vm7 = vcmp.lt.s32.totalorder %v3889_v38, 256  ;;  %s2181_s12 = scalar_lea.vmem %s2180_s9, 64 }
 0x3a2   : > { %v1469_v30 = vpop.permute.xlu1 %1468  ;;  %v1946_v17 = vadd.f32 %v1930_v0, %v1818_v15  ;;  %v1947_v7 = vadd.f32 %v1931_v24, %v1819_v5  ;;  %v1837_v18 = vpop.permute.xlu0 %1836  ;;  %p2183_p4 = scmp.lt.s32.totalorder %s2181_s12, %s2175_s28 }
 0x3a3   : > { %v1477_v39 = vsel %vm775_vm3, %v1453_v51, %v1469_v30  ;;  %v1485_v2 = vsel %vm775_vm3, %v1469_v30, %v1453_v51 }
 0x3a4   : > { %v1548_v13 = vmul.f32 %v3883_v23, %v1485_v2  ;;  %v1549_v29 = vmul.f32 %v3883_v23, %v1477_v39  ;;  %v1955_v37 = vadd.f32 %v1954_v34, %v1946_v17  ;;  %v1968_v36 = vadd.f32 %v1967_v8, %v1947_v7  ;;  %p2184_p5 = por %p2183_p4, %p2182_p3 }
 0x3a6   : > { %v1597_v45 = vpop.permute.xlu1 %1596  ;;  %v1564_v63 = vadd.f32 %v1548_v13, %v1436_v4  ;;  %v1565_v21 = vadd.f32 %v1549_v29, %v1437_v41  ;;  %v3888_v4 = vld [vmem:[#allocation7_spill] sm:$0xff]  ;;  %p2185_p7 = pnand %p2184_p5, %p2178_p2 }
 0x3a7   : > { %v1605_v51 = vsel %vm824_vm2, %v1581_v14, %v1597_v45  ;;  %v1613_v49 = vsel %vm824_vm2, %v1597_v45, %v1581_v14  ;;  %v1988_v23 = vsub.s32 %v1985_v53, %v3888_v4 }
 0x3a8   : > { %v1676_v1 = vmul.f32 %v3885_v10, %v1613_v49  ;;  %v1677_v14 = vmul.f32 %v3885_v10, %v1605_v51 }
 0x3aa   : > { %v1725_v46 = vpop.permute.xlu1 %1724  ;;  %v1692_v11 = vadd.f32 %v1676_v1, %v1564_v63  ;;  %v1693_v32 = vadd.f32 %v1677_v14, %v1565_v21 }
 0x3ab   : > { %v1733_v50 = vsel %vm873_vm4, %v1709_v43, %v1725_v46  ;;  %v1741_v16 = vsel %vm873_vm4, %v1725_v46, %v1709_v43 }
 0x3ac   : > { %v1804_v60 = vmul.f32 %v3886_v61, %v1733_v50  ;;  %v1805_v57 = vmul.f32 %v3886_v61, %v1741_v16 }
 0x3ae   : > { %v1853_v25 = vpop.permute.xlu1 %1852  ;;  %v1820_v52 = vadd.f32 %v1804_v60, %v1692_v11  ;;  %v1821_v62 = vadd.f32 %v1805_v57, %v1693_v32 }
 0x3af   : > { %v1861_v43 = vsel %vm922_vm5, %v1837_v18, %v1853_v25  ;;  %v1869_v30 = vsel %vm922_vm5, %v1853_v25, %v1837_v18 }
 0x3b0   : > { %v1932_v44 = vmul.f32 %v3887_v26, %v1861_v43  ;;  %v1933_v59 = vmul.f32 %v3887_v26, %v1869_v30 }
 0x3b2   : > { %v1948_v3 = vadd.f32 %v1932_v44, %v1820_v52  ;;  %v1949_v20 = vadd.f32 %v1933_v59, %v1821_v62 }
 0x3b4   : > { %v1956_v48 = vadd.f32 %v1955_v37, %v1948_v3  ;;  %v1969_v6 = vadd.f32 %v1968_v36, %v1949_v20 }
 0x3b6   : > { %v1957_v56 = vrot.slane %v1956_v48, 4  ;;  %v1970_v19 = vrot.slane %v1969_v6, 4 }
 0x3b8   : > { %v1958_v39 = vadd.f32 %v1957_v56, %v1956_v48  ;;  %v1971_v2 = vadd.f32 %v1970_v19, %v1969_v6 }
 0x3ba   : > { %v1959_v42 = vrot.slane %v1958_v39, 2  ;;  %v1972_v12 = vrot.slane %v1971_v2, 2 }
 0x3bc   : > { %v1960_v55 = vadd.f32 %v1959_v42, %v1958_v39  ;;  %v1973_v28 = vadd.f32 %v1972_v12, %v1971_v2 }
 0x3be   : > { %v1961_v33 = vrot.slane %v1960_v55, 1  ;;  %v1974_v45 = vrot.slane %v1973_v28, 1 }
 0x3c0   : > { %v1962_v51 = vadd.f32 %v1961_v33, %v1960_v55  ;;  %v1975_v49 = vadd.f32 %v1974_v45, %v1973_v28 }
 0x3c2   : > { %v1978_v35 = vadd.f32 %v1977_v31, %v1962_v51  ;;  %v1979_v27 = vadd.f32 %v1977_v31, %v1975_v49 }
 0x3c4   : > { %v1982_v13 = vcombine.low %v1978_v35, %v1979_v27 }
 0x3c6   : > { %v1989_v29 = vrot.slane %v1982_v13, %v1988_v23 }
 0x3c8   : > { %v1996_v15 = vrot.slane %v1989_v29, %v1988_v23 }
 0x3ca   : > { %2002 = vst.msk [vmem:[%s402_s30] sm:$0x3] %vm2000_vm7, %v1996_v15 }
 0x3cb   : > { %2188 = shalt.err (!%p2185_p7)
}
 0x3cc   : > { %s2189_s19 = scalar_lea.hbm %s2016_s26, 32  ;;  %s2193_s30 = scalar_lea.hbm %s3842_s10, 64 }
 0x3cd   : > { %p2190_p10 = scmp.ne.s32.totalorder %s2016_s26, %s2189_s19  ;;  %p2194_p13 = scmp.lt.s32.totalorder %s2016_s26, %s3842_s10 }
 0x3ce   : > { %p2195_p0 = scmp.lt.s32.totalorder %s2193_s30, %s2189_s19 }
 0x3cf   : > { %p2191_p11 = pnand %p2190_p10, %p2342_p6 }
 0x3d0   : > { %p2196_p1 = por %p2195_p0, %p2194_p13 }
 0x3d1   : > { %p2192_p12 = pneg %p2191_p11 }
 0x3d3   : > { %p2197_p9 = pnand %p2196_p1, %p2192_p12 }
 0x3d5   : > { %2200 = shalt.err (!%p2197_p9)
}
 0x3d6   : > { %2127 = dma.vmem_to_hbm [thread:$0]  (%p2342_p6), %s2019_s11, 32, %s2016_s26, %s2004_s27  }
 0x3d7 PF: > { %s2030_s28 = sand.u32 1, %s2223_s15   ;;  %p3890_p2 = scmp.ge.s32.totalorder %s2235_s18, 2 }
 0x3d8   : > { %s2031_s29 = scalar_lea.sflag [#allocation5], %s2030_s28 }
 0x3d9   : > { %p2130_p3 = pnand %p3890_p2, %p2346_p8 }
 0x3db   : > { %p2131_p4 = pneg %p2130_p3 }
 0x3dd   : > { %2218 = dma.done.wait (%p2131_p4), %s2031_s29, 32  }
 0x3de   : > { %2220 = vsyncadd (%p2131_p4), %s2031_s29, 4294967264  ;;  %p21_p9 = scmp.ge.s32.totalorder %s2328_s20, 4   ;;  %s3891_s15 = smov %s2227_s16 }
 0x3df   : > { %s3892_s16 = smov %s2231_s17  ;;  %s3893_s17 = smov %s2340_s23 }
 0x3e0   : > { %s3894_s18 = smov %s2328_s20  ;;  %23 = sbr.rel (!%p21_p9) target bundleno = 5 (0x5), region = 126 }
 0x3e5   :  { %2036 = vsyncpa [#allocation5], 1 }
 0x3e6   :  { %2038 = vsyncpa [#allocation5 + $0x1], 1 }

</bundles_post_ra>
